<compile_context>
chip_gen: v5e
topology: v5e:2x2
jax: 0.10.0
libtpu: 0.0.40
codegen_flags: <defaults>
</compile_context>

<pallas_src>
import jax
import jax.numpy as jnp
from jax.experimental import pallas as pl
from jax.experimental.pallas import tpu as pltpu

_EPS = 1e-5
_NEG = -3.0e38  # max-pool padding value (finite "-inf")

_WEIGHT_ORDER = (
    "m1_w", "m1_sb",
    "sk2_e1_w", "sk2_e1_sb", "sk2_e2_w", "sk2_e2_sb",
    "sk2_f1_w", "sk2_f1_sb", "sk2_f2_w", "sk2_f2_sb",
    "sk2_a_w", "sk2_a_sb", "sk2_b_w", "sk2_b_sb",
    "sk3_e1_w", "sk3_e1_sb", "sk3_e2_w", "sk3_e2_sb",
    "sk3_f1_w", "sk3_f1_sb", "sk3_f2_w", "sk3_f2_sb",
    "sk3_a_w", "sk3_a_sb", "sk3_b_w", "sk3_b_sb",
    "fc_w", "fc_b",
)


# ----------------------------- fused Pallas kernel ---------------------------

def _sknet_kernel(
    # inputs
    x_ref,
    m1_w, m1_sb,
    s2_e1_w, s2_e1_sb, s2_e2_w, s2_e2_sb,
    s2_f1_w, s2_f1_sb, s2_f2_w, s2_f2_sb,
    s2_a_w, s2_a_sb, s2_b_w, s2_b_sb,
    s3_e1_w, s3_e1_sb, s3_e2_w, s3_e2_sb,
    s3_f1_w, s3_f1_sb, s3_f2_w, s3_f2_sb,
    s3_a_w, s3_a_sb, s3_b_w, s3_b_sb,
    fc_w, fc_b,
    # output
    o_ref,
    # scratch: padded conv / pool input buffers (VMEM, persistent per grid step)
    pad_m1, pad_p1, pad_s2, pad_p2, pad_s3,
):
    f32 = jnp.float32
    _, L0, Cin = x_ref.shape
    C1 = m1_w.shape[1]
    C2 = s2_e1_w.shape[1]
    C3 = s3_e1_w.shape[1]
    L1 = (L0 + 2 * 1 - 3) // 2 + 1   # after pooling1 (k=3, s=2, p=1)
    L2 = (L1 + 2 * 2 - 5) // 2 + 1   # after pooling2 (k=5, s=2, p=2)

    def set_boundary(dst_ref, pad, lin, fill):
        # write only the pad rows (interior is written separately -> no double write)
        rows = jnp.full((pad, dst_ref.shape[1]), fill, f32)
        dst_ref[0:pad, :] = rows
        dst_ref[pad + lin:pad + lin + pad, :] = rows

    def conv_bn_relu(pad_ref, base, w_ref, sb_ref, k, lout, cin, double):
        # sum over K taps of (lout, cin) @ (cin, cout); BN folded into scale/bias rows.
        # `base` lets a k=3 (pad=1) conv read from a shared pad=2 buffer.
        acc = jnp.dot(pad_ref[base:base + lout, :], w_ref[0:cin, :],
                      preferred_element_type=f32)
        for t in range(1, k):
            acc = acc + jnp.dot(pad_ref[base + t:base + t + lout, :],
                                w_ref[t * cin:(t + 1) * cin, :],
                                preferred_element_type=f32)
        y = jnp.maximum(acc * sb_ref[0:1, :] + sb_ref[1:2, :], 0.0)
        if double:  # encoder path has a second BN+ReLU
            y = jnp.maximum(y * sb_ref[2:3, :] + sb_ref[3:4, :], 0.0)
        return y  # (lout, cout)

    def maxpool_into(src_ref, k, stride, lout, dst_ref, dpad):
        # src_ref holds the -big padded input; write pooled rows straight into
        # the (boundary-zeroed) shared conv pad buffer of the next block.
        for lo in range(lout):
            s = lo * stride
            m = src_ref[s:s + 1, :]
            for t in range(1, k):
                m = jnp.maximum(m, src_ref[s + t:s + t + 1, :])
            dst_ref[dpad + lo:dpad + lo + 1, :] = m

    def dense_relu(v, w_ref, sb_ref):
        y = jnp.dot(v, w_ref[...], preferred_element_type=f32)
        return jnp.maximum(y * sb_ref[0:1, :] + sb_ref[1:2, :], 0.0)

    def sk_attention(x1, x2, f1w, f1sb, f2w, f2sb, aw, asb, bw, bsb):
        xl = x1.shape[0]
        gap = jnp.sum(x1 + x2, axis=0, keepdims=True) * (1.0 / xl)   # (1, C)
        z = dense_relu(gap, f1w, f1sb)                               # (1, 50)
        z = dense_relu(z, f2w, f2sb)                                 # (1, C)
        s1 = dense_relu(z, aw, asb)                                  # SE1
        s2 = dense_relu(z, bw, bsb)                                  # SE2
        m = jnp.maximum(s1, s2)                                      # 2-way softmax
        e1 = jnp.exp(s1 - m)
        e2 = jnp.exp(s2 - m)
        inv = pl.reciprocal(e1 + e2, approx=True)                    # EUP slot
        return (e1 * inv) * x1 + (e2 * inv) * x2                     # (L, C)

    # ---- M_layer1: Conv1d(Cin->20, k=3, p=1) + BN + ReLU -----------------
    set_boundary(pad_m1, 1, L0, 0.0)
    pad_m1[1:1 + L0, :] = x_ref[0]
    h1 = conv_bn_relu(pad_m1, 0, m1_w, m1_sb, 3, L0, Cin, double=False)   # (L0, C1)

    # ---- pooling1: MaxPool1d(k=3, s=2, p=1) -> shared SK2 pad buffer -----
    set_boundary(pad_p1, 1, L0, _NEG)
    pad_p1[1:1 + L0, :] = h1
    set_boundary(pad_s2, 2, L1, 0.0)
    maxpool_into(pad_p1, 3, 2, L1, pad_s2, 2)

    # ---- M_layer2: SK_block(20 -> 40) ------------------------------------
    x1 = conv_bn_relu(pad_s2, 1, s2_e1_w, s2_e1_sb, 3, L1, C1, double=True)
    x2 = conv_bn_relu(pad_s2, 0, s2_e2_w, s2_e2_sb, 5, L1, C1, double=True)
    h2 = sk_attention(x1, x2, s2_f1_w, s2_f1_sb, s2_f2_w, s2_f2_sb,
                      s2_a_w, s2_a_sb, s2_b_w, s2_b_sb)               # (L1, C2)

    # ---- pooling2: MaxPool1d(k=5, s=2, p=2) -> shared SK3 pad buffer -----
    set_boundary(pad_p2, 2, L1, _NEG)
    pad_p2[2:2 + L1, :] = h2
    set_boundary(pad_s3, 2, L2, 0.0)
    maxpool_into(pad_p2, 5, 2, L2, pad_s3, 2)

    # ---- M_layer3: SK_block(40 -> 80) ------------------------------------
    y1 = conv_bn_relu(pad_s3, 1, s3_e1_w, s3_e1_sb, 3, L2, C2, double=True)
    y2 = conv_bn_relu(pad_s3, 0, s3_e2_w, s3_e2_sb, 5, L2, C2, double=True)
    h3 = sk_attention(y1, y2, s3_f1_w, s3_f1_sb, s3_f2_w, s3_f2_sb,
                      s3_a_w, s3_a_sb, s3_b_w, s3_b_sb)               # (L2, C3)

    # ---- fc + softmax (fc_w rows pre-permuted to (l, c) ordering) --------
    logits = fc_b[...]                                                # (1, nc)
    for l in range(L2):
        logits = logits + jnp.dot(h3[l:l + 1, :],
                                  fc_w[l * C3:(l + 1) * C3, :],
                                  preferred_element_type=f32)
    logits = logits - jnp.max(logits, axis=1, keepdims=True)
    e = jnp.exp(logits)
    o_ref[0] = e * (1.0 / jnp.sum(e, axis=1, keepdims=True))          # exact softmax


# ------------------------------ forward wrapper ------------------------------

def sknet_forward(prep, x):
    """x: (B, n_channels, L) in PyTorch NCL layout."""
    B, Cin, L0 = x.shape
    x_cl = jnp.transpose(x, (0, 2, 1))                    # channel-last (B, L, Cin)
    weights = [prep[k] for k in _WEIGHT_ORDER]
    C1 = prep["m1_w"].shape[1]
    C2 = prep["sk2_e1_w"].shape[1]
    nc = prep["fc_b"].shape[1]
    L1 = (L0 + 2 * 1 - 3) // 2 + 1
    L2 = (L1 + 2 * 2 - 5) // 2 + 1

    in_specs = [pl.BlockSpec((1, L0, Cin), lambda b: (b, 0, 0))]
    in_specs += [pl.BlockSpec(w.shape, lambda b: (0, 0)) for w in weights]

    scratch_shapes = [
        pltpu.VMEM((L0 + 2, Cin), jnp.float32),   # M_layer1 conv pad (p=1)
        pltpu.VMEM((L0 + 2, C1), jnp.float32),    # pooling1 pad (p=1)
        pltpu.VMEM((L1 + 4, C1), jnp.float32),    # SK2 shared encoder pad (p=2)
        pltpu.VMEM((L1 + 4, C2), jnp.float32),    # pooling2 pad (p=2)
        pltpu.VMEM((L2 + 4, C2), jnp.float32),    # SK3 shared encoder pad (p=2)
    ]

    out = pl.pallas_call(
        _sknet_kernel,
        out_shape=jax.ShapeDtypeStruct((B, 1, nc), jnp.float32),
        grid=(B,),
        in_specs=in_specs,
        out_specs=pl.BlockSpec((1, 1, nc), lambda b: (b, 0, 0)),
        scratch_shapes=scratch_shapes,
        compiler_params=pltpu.CompilerParams(
            dimension_semantics=("parallel",)),
    )(x_cl, *weights)
    return out.reshape(B, nc)


# ----------------------- offline parameter preparation -----------------------

def prepare_params(params):
    """Fold BN, reshape conv weights to (K*Cin, Cout), permute fc weight. Run once."""
    def fold_bn(conv_bias, bn):
        s = bn["gamma"] / jnp.sqrt(bn["var"] + _EPS)
        return s, (conv_bias - bn["mean"]) * s + bn["beta"]

    def conv_weight(w):                       # (cout, cin, k) -> (k*cin, cout), tap-major
        cout, cin, k = w.shape
        return jnp.transpose(w, (2, 1, 0)).reshape(k * cin, cout)

    def one_conv(oc, bn2=None):
        s1, b1 = fold_bn(oc["b"], oc["bn"])
        rows = [s1, b1]
        if bn2 is not None:
            s2 = bn2["gamma"] / jnp.sqrt(bn2["var"] + _EPS)
            rows += [s2, bn2["beta"] - bn2["mean"] * s2]
        return conv_weight(oc["w"]), jnp.stack(rows, axis=0)

    prep = {}
    prep["m1_w"], prep["m1_sb"] = one_conv(params["m1"])
    for name in ("sk2", "sk3"):
        sk = params[name]
        prep[f"{name}_e1_w"], prep[f"{name}_e1_sb"] = one_conv(sk["enc1"], sk["enc1_bn2"])
        prep[f"{name}_e2_w"], prep[f"{name}_e2_sb"] = one_conv(sk["enc2"], sk["enc2_bn2"])
        prep[f"{name}_f1_w"], prep[f"{name}_f1_sb"] = one_conv(sk["fc1"])
        prep[f"{name}_f2_w"], prep[f"{name}_f2_sb"] = one_conv(sk["fc2"])
        prep[f"{name}_a_w"], prep[f"{name}_a_sb"] = one_conv(sk["se1"])
        prep[f"{name}_b_w"], prep[f"{name}_b_sb"] = one_conv(sk["se2"])
    nc, feat = params["fc_w"].shape
    c_last = params["sk3"]["enc1"]["w"].shape[0]          # 80
    l_last = feat // c_last                               # 3
    # torch flattens NCL (channel-major); kernel flattens channel-last (position-major)
    prep["fc_w"] = (params["fc_w"].reshape(nc, c_last, l_last)
                    .transpose(2, 1, 0).reshape(feat, nc))
    prep["fc_b"] = params["fc_b"].reshape(1, nc)
    return prep


# ---------------------------- pure-JAX reference -----------------------------

def _ref_oneconv(x, oc, pad, bn2=None):
    y = jax.lax.conv_general_dilated(
        x, oc["w"], window_strides=(1,), padding=[(pad, pad)],
        dimension_numbers=("NCH", "OIH", "NCH"))
    y = y + oc["b"][None, :, None]

    def bn_apply(v, bn):
        return ((v - bn["mean"][None, :, None])
                / jnp.sqrt(bn["var"][None, :, None] + _EPS)
                * bn["gamma"][None, :, None] + bn["beta"][None, :, None])

    y = jnp.maximum(bn_apply(y, oc["bn"]), 0.0)
    if bn2 is not None:
        y = jnp.maximum(bn_apply(y, bn2), 0.0)
    return y


def _ref_maxpool(x, k, s, p):
    return jax.lax.reduce_window(x, -jnp.inf, jax.lax.max,
                                 (1, 1, k), (1, 1, s),
                                 [(0, 0), (0, 0), (p, p)])


def _ref_sk(x, p):
    x1 = _ref_oneconv(x, p["enc1"], 1, p["enc1_bn2"])
    x2 = _ref_oneconv(x, p["enc2"], 2, p["enc2_bn2"])
    gap = jnp.mean(x1 + x2, axis=2, keepdims=True)
    z = _ref_oneconv(gap, p["fc1"], 0)
    z = _ref_oneconv(z, p["fc2"], 0)
    s1 = _ref_oneconv(z, p["se1"], 0)
    s2 = _ref_oneconv(z, p["se2"], 0)
    att = jax.nn.softmax(jnp.concatenate([s1, s2], axis=2), axis=2)
    return att[:, :, 0:1] * x1 + att[:, :, 1:2] * x2


def sknet_reference(params, x):
    y = _ref_oneconv(x, params["m1"], 1)
    y = _ref_maxpool(y, 3, 2, 1)
    y = _ref_sk(y, params["sk2"])
    y = _ref_maxpool(y, 5, 2, 2)
    y = _ref_sk(y, params["sk3"])
    flat = y.reshape(y.shape[0], -1)
    logits = flat @ params["fc_w"].T + params["fc_b"]
    return jax.nn.softmax(logits, axis=1)


# ------------------------------ parameter init -------------------------------

def _make_bn(kg, c):
    return dict(gamma=1.0 + 0.1 * jax.random.normal(kg(), (c,), jnp.float32),
                beta=0.1 * jax.random.normal(kg(), (c,), jnp.float32),
                mean=0.1 * jax.random.normal(kg(), (c,), jnp.float32),
                var=1.0 + 0.1 * jnp.abs(jax.random.normal(kg(), (c,), jnp.float32)))


def _make_oneconv(kg, cin, cout, k):
    return dict(w=0.2 * jax.random.normal(kg(), (cout, cin, k), jnp.float32),
                b=0.1 * jax.random.normal(kg(), (cout,), jnp.float32),
                bn=_make_bn(kg, cout))


def _make_sk(kg, cin, cout):
    return dict(enc1=_make_oneconv(kg, cin, cout, 3), enc1_bn2=_make_bn(kg, cout),
                enc2=_make_oneconv(kg, cin, cout, 5), enc2_bn2=_make_bn(kg, cout),
                fc1=_make_oneconv(kg, cout, 50, 1),
                fc2=_make_oneconv(kg, 50, cout, 1),
                se1=_make_oneconv(kg, cout, cout, 1),
                se2=_make_oneconv(kg, cout, cout, 1))


def make_params(seed, n_channels, n_classes):
    key = [jax.random.PRNGKey(seed)]

    def kg():
        key[0], sub = jax.random.split(key[0])
        return sub

    return dict(m1=_make_oneconv(kg, n_channels, 20, 3),
                sk2=_make_sk(kg, 20, 40),
                sk3=_make_sk(kg, 40, 80),
                fc_w=0.1 * jax.random.normal(kg(), (n_classes, 240), jnp.float32),
                fc_b=0.1 * jax.random.normal(kg(), (n_classes,), jnp.float32))


# ----------------------------------- main ------------------------------------

if __name__ == "__main__":
    n_channels, n_classes = 4, 5
    B, L = 2, 12    # L=12 -> pool1 -> 6 -> pool2 -> 3; 80 channels * 3 = 240 for the FC
    params = make_params(0, n_channels, n_classes)
    prep = prepare_params(params)
    x = jax.random.normal(jax.random.PRNGKey(0), (B, n_channels, L), jnp.float32)

    fwd = jax.jit(sknet_forward)
    out = jax.block_until_ready(fwd(prep, x))

    with jax.default_matmul_precision("highest"):
        ref = jax.block_until_ready(jax.jit(sknet_reference)(params, x))

    assert out.shape == (B, n_classes)
    assert bool(jnp.all(jnp.isfinite(out)))
    assert bool(jnp.allclose(jnp.sum(out, axis=1), 1.0, atol=1e-5))
    assert bool(jnp.allclose(out, ref, atol=1e-2)), (out, ref)
    print("KERNEL_OK")
</pallas_src>

<mosaic_0001>
module attributes {stable_mosaic.version = 11 : i64} {
  func.func @_sknet_kernel(%arg0: i32, %arg1: memref<1x12x4xf32, #tpu.memory_space<vmem>>, %arg2: memref<12x20xf32, #tpu.memory_space<vmem>>, %arg3: memref<2x20xf32, #tpu.memory_space<vmem>>, %arg4: memref<60x40xf32, #tpu.memory_space<vmem>>, %arg5: memref<4x40xf32, #tpu.memory_space<vmem>>, %arg6: memref<100x40xf32, #tpu.memory_space<vmem>>, %arg7: memref<4x40xf32, #tpu.memory_space<vmem>>, %arg8: memref<40x50xf32, #tpu.memory_space<vmem>>, %arg9: memref<2x50xf32, #tpu.memory_space<vmem>>, %arg10: memref<50x40xf32, #tpu.memory_space<vmem>>, %arg11: memref<2x40xf32, #tpu.memory_space<vmem>>, %arg12: memref<40x40xf32, #tpu.memory_space<vmem>>, %arg13: memref<2x40xf32, #tpu.memory_space<vmem>>, %arg14: memref<40x40xf32, #tpu.memory_space<vmem>>, %arg15: memref<2x40xf32, #tpu.memory_space<vmem>>, %arg16: memref<120x80xf32, #tpu.memory_space<vmem>>, %arg17: memref<4x80xf32, #tpu.memory_space<vmem>>, %arg18: memref<200x80xf32, #tpu.memory_space<vmem>>, %arg19: memref<4x80xf32, #tpu.memory_space<vmem>>, %arg20: memref<80x50xf32, #tpu.memory_space<vmem>>, %arg21: memref<2x50xf32, #tpu.memory_space<vmem>>, %arg22: memref<50x80xf32, #tpu.memory_space<vmem>>, %arg23: memref<2x80xf32, #tpu.memory_space<vmem>>, %arg24: memref<80x80xf32, #tpu.memory_space<vmem>>, %arg25: memref<2x80xf32, #tpu.memory_space<vmem>>, %arg26: memref<80x80xf32, #tpu.memory_space<vmem>>, %arg27: memref<2x80xf32, #tpu.memory_space<vmem>>, %arg28: memref<240x5xf32, #tpu.memory_space<vmem>>, %arg29: memref<1x5xf32, #tpu.memory_space<vmem>>, %arg30: memref<1x1x5xf32, #tpu.memory_space<vmem>>, %arg31: memref<14x4xf32, #tpu.memory_space<vmem>>, %arg32: memref<14x20xf32, #tpu.memory_space<vmem>>, %arg33: memref<10x20xf32, #tpu.memory_space<vmem>>, %arg34: memref<10x40xf32, #tpu.memory_space<vmem>>, %arg35: memref<7x40xf32, #tpu.memory_space<vmem>>) attributes {dimension_semantics = [#tpu.dimension_semantics<parallel>], iteration_bounds = array<i64: 2>, scalar_prefetch = 0 : i64, scratch_operands = 5 : i64, tpu.core_type = #tpu.core_type<tc>, window_params = [{transform_indices = @transform_0, window_bounds = array<i64: 1, 12, 4>}, {pipeline_mode = #tpu.pipeline_mode<synchronous>, transform_indices = @transform_1, window_bounds = array<i64: 12, 20>}, {pipeline_mode = #tpu.pipeline_mode<synchronous>, transform_indices = @transform_2, window_bounds = array<i64: 2, 20>}, {pipeline_mode = #tpu.pipeline_mode<synchronous>, transform_indices = @transform_3, window_bounds = array<i64: 60, 40>}, {pipeline_mode = #tpu.pipeline_mode<synchronous>, transform_indices = @transform_4, window_bounds = array<i64: 4, 40>}, {pipeline_mode = #tpu.pipeline_mode<synchronous>, transform_indices = @transform_5, window_bounds = array<i64: 100, 40>}, {pipeline_mode = #tpu.pipeline_mode<synchronous>, transform_indices = @transform_6, window_bounds = array<i64: 4, 40>}, {pipeline_mode = #tpu.pipeline_mode<synchronous>, transform_indices = @transform_7, window_bounds = array<i64: 40, 50>}, {pipeline_mode = #tpu.pipeline_mode<synchronous>, transform_indices = @transform_8, window_bounds = array<i64: 2, 50>}, {pipeline_mode = #tpu.pipeline_mode<synchronous>, transform_indices = @transform_9, window_bounds = array<i64: 50, 40>}, {pipeline_mode = #tpu.pipeline_mode<synchronous>, transform_indices = @transform_10, window_bounds = array<i64: 2, 40>}, {pipeline_mode = #tpu.pipeline_mode<synchronous>, transform_indices = @transform_11, window_bounds = array<i64: 40, 40>}, {pipeline_mode = #tpu.pipeline_mode<synchronous>, transform_indices = @transform_12, window_bounds = array<i64: 2, 40>}, {pipeline_mode = #tpu.pipeline_mode<synchronous>, transform_indices = @transform_13, window_bounds = array<i64: 40, 40>}, {pipeline_mode = #tpu.pipeline_mode<synchronous>, transform_indices = @transform_14, window_bounds = array<i64: 2, 40>}, {pipeline_mode = #tpu.pipeline_mode<synchronous>, transform_indices = @transform_15, window_bounds = array<i64: 120, 80>}, {pipeline_mode = #tpu.pipeline_mode<synchronous>, transform_indices = @transform_16, window_bounds = array<i64: 4, 80>}, {pipeline_mode = #tpu.pipeline_mode<synchronous>, transform_indices = @transform_17, window_bounds = array<i64: 200, 80>}, {pipeline_mode = #tpu.pipeline_mode<synchronous>, transform_indices = @transform_18, window_bounds = array<i64: 4, 80>}, {pipeline_mode = #tpu.pipeline_mode<synchronous>, transform_indices = @transform_19, window_bounds = array<i64: 80, 50>}, {pipeline_mode = #tpu.pipeline_mode<synchronous>, transform_indices = @transform_20, window_bounds = array<i64: 2, 50>}, {pipeline_mode = #tpu.pipeline_mode<synchronous>, transform_indices = @transform_21, window_bounds = array<i64: 50, 80>}, {pipeline_mode = #tpu.pipeline_mode<synchronous>, transform_indices = @transform_22, window_bounds = array<i64: 2, 80>}, {pipeline_mode = #tpu.pipeline_mode<synchronous>, transform_indices = @transform_23, window_bounds = array<i64: 80, 80>}, {pipeline_mode = #tpu.pipeline_mode<synchronous>, transform_indices = @transform_24, window_bounds = array<i64: 2, 80>}, {pipeline_mode = #tpu.pipeline_mode<synchronous>, transform_indices = @transform_25, window_bounds = array<i64: 80, 80>}, {pipeline_mode = #tpu.pipeline_mode<synchronous>, transform_indices = @transform_26, window_bounds = array<i64: 2, 80>}, {pipeline_mode = #tpu.pipeline_mode<synchronous>, transform_indices = @transform_27, window_bounds = array<i64: 240, 5>}, {pipeline_mode = #tpu.pipeline_mode<synchronous>, transform_indices = @transform_28, window_bounds = array<i64: 1, 5>}, {transform_indices = @transform_29, window_bounds = array<i64: 1, 1, 5>}]} {
    %cst = arith.constant 0.000000e+00 : f32
    %0 = vector.broadcast %cst : f32 to vector<1x4xf32>
    %c0 = arith.constant 0 : index
    %c0_0 = arith.constant 0 : index
    %1 = vector.load %arg31[%c0, %c0_0] : memref<14x4xf32, #tpu.memory_space<vmem>>, vector<1x4xf32>
    tpu.vector_store %arg31[%c0, %c0_0], %0 {strides = array<i32>} : memref<14x4xf32, #tpu.memory_space<vmem>>, vector<1x4xf32>,
    %c13 = arith.constant 13 : index
    %c0_1 = arith.constant 0 : index
    %2 = vector.load %arg31[%c13, %c0_1] : memref<14x4xf32, #tpu.memory_space<vmem>>, vector<1x4xf32>
    tpu.vector_store %arg31[%c13, %c0_1], %0 {strides = array<i32>} : memref<14x4xf32, #tpu.memory_space<vmem>>, vector<1x4xf32>,
    %c0_2 = arith.constant 0 : index
    %c0_3 = arith.constant 0 : index
    %c0_4 = arith.constant 0 : index
    %3 = vector.load %arg1[%c0_2, %c0_3, %c0_4] : memref<1x12x4xf32, #tpu.memory_space<vmem>>, vector<1x12x4xf32>
    %4 = vector.shape_cast %3 : vector<1x12x4xf32> to vector<12x4xf32>
    %c1 = arith.constant 1 : index
    %c0_5 = arith.constant 0 : index
    %5 = vector.load %arg31[%c1, %c0_5] : memref<14x4xf32, #tpu.memory_space<vmem>>, vector<12x4xf32>
    tpu.vector_store %arg31[%c1, %c0_5], %4 {strides = array<i32>} : memref<14x4xf32, #tpu.memory_space<vmem>>, vector<12x4xf32>,
    %c0_6 = arith.constant 0 : index
    %c0_7 = arith.constant 0 : index
    %6 = vector.load %arg31[%c0_6, %c0_7] : memref<14x4xf32, #tpu.memory_space<vmem>>, vector<12x4xf32>
    %c0_8 = arith.constant 0 : index
    %c0_9 = arith.constant 0 : index
    %7 = vector.load %arg2[%c0_8, %c0_9] : memref<12x20xf32, #tpu.memory_space<vmem>>, vector<4x20xf32>
    %cst_10 = arith.constant dense<0.000000e+00> : vector<12x20xf32>
    %8 = tpu.matmul %6, %7, %cst_10 {dimension_numbers = #tpu.dot_dimension_numbers<[1], [0], [0], [1], [0, 0, 1, 1], [], []>} : vector<12x4xf32>, vector<4x20xf32>, vector<12x20xf32> -> vector<12x20xf32>
    %c1_11 = arith.constant 1 : index
    %c0_12 = arith.constant 0 : index
    %9 = vector.load %arg31[%c1_11, %c0_12] : memref<14x4xf32, #tpu.memory_space<vmem>>, vector<12x4xf32>
    %c4 = arith.constant 4 : index
    %c0_13 = arith.constant 0 : index
    %10 = vector.load %arg2[%c4, %c0_13] : memref<12x20xf32, #tpu.memory_space<vmem>>, vector<4x20xf32>
    %cst_14 = arith.constant dense<0.000000e+00> : vector<12x20xf32>
    %11 = tpu.matmul %9, %10, %cst_14 {dimension_numbers = #tpu.dot_dimension_numbers<[1], [0], [0], [1], [0, 0, 1, 1], [], []>} : vector<12x4xf32>, vector<4x20xf32>, vector<12x20xf32> -> vector<12x20xf32>
    %12 = arith.addf %8, %11 : vector<12x20xf32>
    %c2 = arith.constant 2 : index
    %c0_15 = arith.constant 0 : index
    %13 = vector.load %arg31[%c2, %c0_15] : memref<14x4xf32, #tpu.memory_space<vmem>>, vector<12x4xf32>
    %c8 = arith.constant 8 : index
    %c0_16 = arith.constant 0 : index
    %14 = vector.load %arg2[%c8, %c0_16] : memref<12x20xf32, #tpu.memory_space<vmem>>, vector<4x20xf32>
    %cst_17 = arith.constant dense<0.000000e+00> : vector<12x20xf32>
    %15 = tpu.matmul %13, %14, %cst_17 {dimension_numbers = #tpu.dot_dimension_numbers<[1], [0], [0], [1], [0, 0, 1, 1], [], []>} : vector<12x4xf32>, vector<4x20xf32>, vector<12x20xf32> -> vector<12x20xf32>
    %16 = arith.addf %12, %15 : vector<12x20xf32>
    %c0_18 = arith.constant 0 : index
    %c0_19 = arith.constant 0 : index
    %17 = vector.load %arg3[%c0_18, %c0_19] : memref<2x20xf32, #tpu.memory_space<vmem>>, vector<1x20xf32>
    %18 = vector.broadcast %17 : vector<1x20xf32> to vector<12x20xf32>
    %19 = arith.mulf %16, %18 : vector<12x20xf32>
    %c1_20 = arith.constant 1 : index
    %c0_21 = arith.constant 0 : index
    %20 = vector.load %arg3[%c1_20, %c0_21] : memref<2x20xf32, #tpu.memory_space<vmem>>, vector<1x20xf32>
    %21 = vector.broadcast %20 : vector<1x20xf32> to vector<12x20xf32>
    %22 = arith.addf %19, %21 : vector<12x20xf32>
    %cst_22 = arith.constant 0.000000e+00 : f32
    %23 = vector.broadcast %cst_22 : f32 to vector<12x20xf32>
    %24 = arith.maximumf %22, %23 : vector<12x20xf32>
    %cst_23 = arith.constant -3.000000e+38 : f32
    %25 = vector.broadcast %cst_23 : f32 to vector<1x20xf32>
    %c0_24 = arith.constant 0 : index
    %c0_25 = arith.constant 0 : index
    %26 = vector.load %arg32[%c0_24, %c0_25] : memref<14x20xf32, #tpu.memory_space<vmem>>, vector<1x20xf32>
    tpu.vector_store %arg32[%c0_24, %c0_25], %25 {strides = array<i32>} : memref<14x20xf32, #tpu.memory_space<vmem>>, vector<1x20xf32>,
    %c13_26 = arith.constant 13 : index
    %c0_27 = arith.constant 0 : index
    %27 = vector.load %arg32[%c13_26, %c0_27] : memref<14x20xf32, #tpu.memory_space<vmem>>, vector<1x20xf32>
    tpu.vector_store %arg32[%c13_26, %c0_27], %25 {strides = array<i32>} : memref<14x20xf32, #tpu.memory_space<vmem>>, vector<1x20xf32>,
    %c1_28 = arith.constant 1 : index
    %c0_29 = arith.constant 0 : index
    %28 = vector.load %arg32[%c1_28, %c0_29] : memref<14x20xf32, #tpu.memory_space<vmem>>, vector<12x20xf32>
    tpu.vector_store %arg32[%c1_28, %c0_29], %24 {strides = array<i32>} : memref<14x20xf32, #tpu.memory_space<vmem>>, vector<12x20xf32>,
    %cst_30 = arith.constant 0.000000e+00 : f32
    %29 = vector.broadcast %cst_30 : f32 to vector<2x20xf32>
    %c0_31 = arith.constant 0 : index
    %c0_32 = arith.constant 0 : index
    %30 = vector.load %arg33[%c0_31, %c0_32] : memref<10x20xf32, #tpu.memory_space<vmem>>, vector<2x20xf32>
    tpu.vector_store %arg33[%c0_31, %c0_32], %29 {strides = array<i32>} : memref<10x20xf32, #tpu.memory_space<vmem>>, vector<2x20xf32>,
    %c8_33 = arith.constant 8 : index
    %c0_34 = arith.constant 0 : index
    %31 = vector.load %arg33[%c8_33, %c0_34] : memref<10x20xf32, #tpu.memory_space<vmem>>, vector<2x20xf32>
    tpu.vector_store %arg33[%c8_33, %c0_34], %29 {strides = array<i32>} : memref<10x20xf32, #tpu.memory_space<vmem>>, vector<2x20xf32>,
    %c0_35 = arith.constant 0 : index
    %c0_36 = arith.constant 0 : index
    %32 = vector.load %arg32[%c0_35, %c0_36] : memref<14x20xf32, #tpu.memory_space<vmem>>, vector<1x20xf32>
    %c1_37 = arith.constant 1 : index
    %c0_38 = arith.constant 0 : index
    %33 = vector.load %arg32[%c1_37, %c0_38] : memref<14x20xf32, #tpu.memory_space<vmem>>, vector<1x20xf32>
    %34 = arith.maximumf %32, %33 : vector<1x20xf32>
    %c2_39 = arith.constant 2 : index
    %c0_40 = arith.constant 0 : index
    %35 = vector.load %arg32[%c2_39, %c0_40] : memref<14x20xf32, #tpu.memory_space<vmem>>, vector<1x20xf32>
    %36 = arith.maximumf %34, %35 : vector<1x20xf32>
    %c2_41 = arith.constant 2 : index
    %c0_42 = arith.constant 0 : index
    %37 = vector.load %arg33[%c2_41, %c0_42] : memref<10x20xf32, #tpu.memory_space<vmem>>, vector<1x20xf32>
    tpu.vector_store %arg33[%c2_41, %c0_42], %36 {strides = array<i32>} : memref<10x20xf32, #tpu.memory_space<vmem>>, vector<1x20xf32>,
    %c2_43 = arith.constant 2 : index
    %c0_44 = arith.constant 0 : index
    %38 = vector.load %arg32[%c2_43, %c0_44] : memref<14x20xf32, #tpu.memory_space<vmem>>, vector<1x20xf32>
    %c3 = arith.constant 3 : index
    %c0_45 = arith.constant 0 : index
    %39 = vector.load %arg32[%c3, %c0_45] : memref<14x20xf32, #tpu.memory_space<vmem>>, vector<1x20xf32>
    %40 = arith.maximumf %38, %39 : vector<1x20xf32>
    %c4_46 = arith.constant 4 : index
    %c0_47 = arith.constant 0 : index
    %41 = vector.load %arg32[%c4_46, %c0_47] : memref<14x20xf32, #tpu.memory_space<vmem>>, vector<1x20xf32>
    %42 = arith.maximumf %40, %41 : vector<1x20xf32>
    %c3_48 = arith.constant 3 : index
    %c0_49 = arith.constant 0 : index
    %43 = vector.load %arg33[%c3_48, %c0_49] : memref<10x20xf32, #tpu.memory_space<vmem>>, vector<1x20xf32>
    tpu.vector_store %arg33[%c3_48, %c0_49], %42 {strides = array<i32>} : memref<10x20xf32, #tpu.memory_space<vmem>>, vector<1x20xf32>,
    %c4_50 = arith.constant 4 : index
    %c0_51 = arith.constant 0 : index
    %44 = vector.load %arg32[%c4_50, %c0_51] : memref<14x20xf32, #tpu.memory_space<vmem>>, vector<1x20xf32>
    %c5 = arith.constant 5 : index
    %c0_52 = arith.constant 0 : index
    %45 = vector.load %arg32[%c5, %c0_52] : memref<14x20xf32, #tpu.memory_space<vmem>>, vector<1x20xf32>
    %46 = arith.maximumf %44, %45 : vector<1x20xf32>
    %c6 = arith.constant 6 : index
    %c0_53 = arith.constant 0 : index
    %47 = vector.load %arg32[%c6, %c0_53] : memref<14x20xf32, #tpu.memory_space<vmem>>, vector<1x20xf32>
    %48 = arith.maximumf %46, %47 : vector<1x20xf32>
    %c4_54 = arith.constant 4 : index
    %c0_55 = arith.constant 0 : index
    %49 = vector.load %arg33[%c4_54, %c0_55] : memref<10x20xf32, #tpu.memory_space<vmem>>, vector<1x20xf32>
    tpu.vector_store %arg33[%c4_54, %c0_55], %48 {strides = array<i32>} : memref<10x20xf32, #tpu.memory_space<vmem>>, vector<1x20xf32>,
    %c6_56 = arith.constant 6 : index
    %c0_57 = arith.constant 0 : index
    %50 = vector.load %arg32[%c6_56, %c0_57] : memref<14x20xf32, #tpu.memory_space<vmem>>, vector<1x20xf32>
    %c7 = arith.constant 7 : index
    %c0_58 = arith.constant 0 : index
    %51 = vector.load %arg32[%c7, %c0_58] : memref<14x20xf32, #tpu.memory_space<vmem>>, vector<1x20xf32>
    %52 = arith.maximumf %50, %51 : vector<1x20xf32>
    %c8_59 = arith.constant 8 : index
    %c0_60 = arith.constant 0 : index
    %53 = vector.load %arg32[%c8_59, %c0_60] : memref<14x20xf32, #tpu.memory_space<vmem>>, vector<1x20xf32>
    %54 = arith.maximumf %52, %53 : vector<1x20xf32>
    %c5_61 = arith.constant 5 : index
    %c0_62 = arith.constant 0 : index
    %55 = vector.load %arg33[%c5_61, %c0_62] : memref<10x20xf32, #tpu.memory_space<vmem>>, vector<1x20xf32>
    tpu.vector_store %arg33[%c5_61, %c0_62], %54 {strides = array<i32>} : memref<10x20xf32, #tpu.memory_space<vmem>>, vector<1x20xf32>,
    %c8_63 = arith.constant 8 : index
    %c0_64 = arith.constant 0 : index
    %56 = vector.load %arg32[%c8_63, %c0_64] : memref<14x20xf32, #tpu.memory_space<vmem>>, vector<1x20xf32>
    %c9 = arith.constant 9 : index
    %c0_65 = arith.constant 0 : index
    %57 = vector.load %arg32[%c9, %c0_65] : memref<14x20xf32, #tpu.memory_space<vmem>>, vector<1x20xf32>
    %58 = arith.maximumf %56, %57 : vector<1x20xf32>
    %c10 = arith.constant 10 : index
    %c0_66 = arith.constant 0 : index
    %59 = vector.load %arg32[%c10, %c0_66] : memref<14x20xf32, #tpu.memory_space<vmem>>, vector<1x20xf32>
    %60 = arith.maximumf %58, %59 : vector<1x20xf32>
    %c6_67 = arith.constant 6 : index
    %c0_68 = arith.constant 0 : index
    %61 = vector.load %arg33[%c6_67, %c0_68] : memref<10x20xf32, #tpu.memory_space<vmem>>, vector<1x20xf32>
    tpu.vector_store %arg33[%c6_67, %c0_68], %60 {strides = array<i32>} : memref<10x20xf32, #tpu.memory_space<vmem>>, vector<1x20xf32>,
    %c10_69 = arith.constant 10 : index
    %c0_70 = arith.constant 0 : index
    %62 = vector.load %arg32[%c10_69, %c0_70] : memref<14x20xf32, #tpu.memory_space<vmem>>, vector<1x20xf32>
    %c11 = arith.constant 11 : index
    %c0_71 = arith.constant 0 : index
    %63 = vector.load %arg32[%c11, %c0_71] : memref<14x20xf32, #tpu.memory_space<vmem>>, vector<1x20xf32>
    %64 = arith.maximumf %62, %63 : vector<1x20xf32>
    %c12 = arith.constant 12 : index
    %c0_72 = arith.constant 0 : index
    %65 = vector.load %arg32[%c12, %c0_72] : memref<14x20xf32, #tpu.memory_space<vmem>>, vector<1x20xf32>
    %66 = arith.maximumf %64, %65 : vector<1x20xf32>
    %c7_73 = arith.constant 7 : index
    %c0_74 = arith.constant 0 : index
    %67 = vector.load %arg33[%c7_73, %c0_74] : memref<10x20xf32, #tpu.memory_space<vmem>>, vector<1x20xf32>
    tpu.vector_store %arg33[%c7_73, %c0_74], %66 {strides = array<i32>} : memref<10x20xf32, #tpu.memory_space<vmem>>, vector<1x20xf32>,
    %c1_75 = arith.constant 1 : index
    %c0_76 = arith.constant 0 : index
    %68 = vector.load %arg33[%c1_75, %c0_76] : memref<10x20xf32, #tpu.memory_space<vmem>>, vector<6x20xf32>
    %c0_77 = arith.constant 0 : index
    %c0_78 = arith.constant 0 : index
    %69 = vector.load %arg4[%c0_77, %c0_78] : memref<60x40xf32, #tpu.memory_space<vmem>>, vector<20x40xf32>
    %cst_79 = arith.constant dense<0.000000e+00> : vector<6x40xf32>
    %70 = tpu.matmul %68, %69, %cst_79 {dimension_numbers = #tpu.dot_dimension_numbers<[1], [0], [0], [1], [0, 0, 1, 1], [], []>} : vector<6x20xf32>, vector<20x40xf32>, vector<6x40xf32> -> vector<6x40xf32>
    %c2_80 = arith.constant 2 : index
    %c0_81 = arith.constant 0 : index
    %71 = vector.load %arg33[%c2_80, %c0_81] : memref<10x20xf32, #tpu.memory_space<vmem>>, vector<6x20xf32>
    %c20 = arith.constant 20 : index
    %c0_82 = arith.constant 0 : index
    %72 = vector.load %arg4[%c20, %c0_82] : memref<60x40xf32, #tpu.memory_space<vmem>>, vector<20x40xf32>
    %cst_83 = arith.constant dense<0.000000e+00> : vector<6x40xf32>
    %73 = tpu.matmul %71, %72, %cst_83 {dimension_numbers = #tpu.dot_dimension_numbers<[1], [0], [0], [1], [0, 0, 1, 1], [], []>} : vector<6x20xf32>, vector<20x40xf32>, vector<6x40xf32> -> vector<6x40xf32>
    %74 = arith.addf %70, %73 : vector<6x40xf32>
    %c3_84 = arith.constant 3 : index
    %c0_85 = arith.constant 0 : index
    %75 = vector.load %arg33[%c3_84, %c0_85] : memref<10x20xf32, #tpu.memory_space<vmem>>, vector<6x20xf32>
    %c40 = arith.constant 40 : index
    %c0_86 = arith.constant 0 : index
    %76 = vector.load %arg4[%c40, %c0_86] : memref<60x40xf32, #tpu.memory_space<vmem>>, vector<20x40xf32>
    %cst_87 = arith.constant dense<0.000000e+00> : vector<6x40xf32>
    %77 = tpu.matmul %75, %76, %cst_87 {dimension_numbers = #tpu.dot_dimension_numbers<[1], [0], [0], [1], [0, 0, 1, 1], [], []>} : vector<6x20xf32>, vector<20x40xf32>, vector<6x40xf32> -> vector<6x40xf32>
    %78 = arith.addf %74, %77 : vector<6x40xf32>
    %c0_88 = arith.constant 0 : index
    %c0_89 = arith.constant 0 : index
    %79 = vector.load %arg5[%c0_88, %c0_89] : memref<4x40xf32, #tpu.memory_space<vmem>>, vector<1x40xf32>
    %80 = vector.broadcast %79 : vector<1x40xf32> to vector<6x40xf32>
    %81 = arith.mulf %78, %80 : vector<6x40xf32>
    %c1_90 = arith.constant 1 : index
    %c0_91 = arith.constant 0 : index
    %82 = vector.load %arg5[%c1_90, %c0_91] : memref<4x40xf32, #tpu.memory_space<vmem>>, vector<1x40xf32>
    %83 = vector.broadcast %82 : vector<1x40xf32> to vector<6x40xf32>
    %84 = arith.addf %81, %83 : vector<6x40xf32>
    %cst_92 = arith.constant 0.000000e+00 : f32
    %85 = vector.broadcast %cst_92 : f32 to vector<6x40xf32>
    %86 = arith.maximumf %84, %85 : vector<6x40xf32>
    %c2_93 = arith.constant 2 : index
    %c0_94 = arith.constant 0 : index
    %87 = vector.load %arg5[%c2_93, %c0_94] : memref<4x40xf32, #tpu.memory_space<vmem>>, vector<1x40xf32>
    %88 = vector.broadcast %87 : vector<1x40xf32> to vector<6x40xf32>
    %89 = arith.mulf %86, %88 : vector<6x40xf32>
    %c3_95 = arith.constant 3 : index
    %c0_96 = arith.constant 0 : index
    %90 = vector.load %arg5[%c3_95, %c0_96] : memref<4x40xf32, #tpu.memory_space<vmem>>, vector<1x40xf32>
    %91 = vector.broadcast %90 : vector<1x40xf32> to vector<6x40xf32>
    %92 = arith.addf %89, %91 : vector<6x40xf32>
    %cst_97 = arith.constant 0.000000e+00 : f32
    %93 = vector.broadcast %cst_97 : f32 to vector<6x40xf32>
    %94 = arith.maximumf %92, %93 : vector<6x40xf32>
    %c0_98 = arith.constant 0 : index
    %c0_99 = arith.constant 0 : index
    %95 = vector.load %arg33[%c0_98, %c0_99] : memref<10x20xf32, #tpu.memory_space<vmem>>, vector<6x20xf32>
    %c0_100 = arith.constant 0 : index
    %c0_101 = arith.constant 0 : index
    %96 = vector.load %arg6[%c0_100, %c0_101] : memref<100x40xf32, #tpu.memory_space<vmem>>, vector<20x40xf32>
    %cst_102 = arith.constant dense<0.000000e+00> : vector<6x40xf32>
    %97 = tpu.matmul %95, %96, %cst_102 {dimension_numbers = #tpu.dot_dimension_numbers<[1], [0], [0], [1], [0, 0, 1, 1], [], []>} : vector<6x20xf32>, vector<20x40xf32>, vector<6x40xf32> -> vector<6x40xf32>
    %c1_103 = arith.constant 1 : index
    %c0_104 = arith.constant 0 : index
    %98 = vector.load %arg33[%c1_103, %c0_104] : memref<10x20xf32, #tpu.memory_space<vmem>>, vector<6x20xf32>
    %c20_105 = arith.constant 20 : index
    %c0_106 = arith.constant 0 : index
    %99 = vector.load %arg6[%c20_105, %c0_106] : memref<100x40xf32, #tpu.memory_space<vmem>>, vector<20x40xf32>
    %cst_107 = arith.constant dense<0.000000e+00> : vector<6x40xf32>
    %100 = tpu.matmul %98, %99, %cst_107 {dimension_numbers = #tpu.dot_dimension_numbers<[1], [0], [0], [1], [0, 0, 1, 1], [], []>} : vector<6x20xf32>, vector<20x40xf32>, vector<6x40xf32> -> vector<6x40xf32>
    %101 = arith.addf %97, %100 : vector<6x40xf32>
    %c2_108 = arith.constant 2 : index
    %c0_109 = arith.constant 0 : index
    %102 = vector.load %arg33[%c2_108, %c0_109] : memref<10x20xf32, #tpu.memory_space<vmem>>, vector<6x20xf32>
    %c40_110 = arith.constant 40 : index
    %c0_111 = arith.constant 0 : index
    %103 = vector.load %arg6[%c40_110, %c0_111] : memref<100x40xf32, #tpu.memory_space<vmem>>, vector<20x40xf32>
    %cst_112 = arith.constant dense<0.000000e+00> : vector<6x40xf32>
    %104 = tpu.matmul %102, %103, %cst_112 {dimension_numbers = #tpu.dot_dimension_numbers<[1], [0], [0], [1], [0, 0, 1, 1], [], []>} : vector<6x20xf32>, vector<20x40xf32>, vector<6x40xf32> -> vector<6x40xf32>
    %105 = arith.addf %101, %104 : vector<6x40xf32>
    %c3_113 = arith.constant 3 : index
    %c0_114 = arith.constant 0 : index
    %106 = vector.load %arg33[%c3_113, %c0_114] : memref<10x20xf32, #tpu.memory_space<vmem>>, vector<6x20xf32>
    %c60 = arith.constant 60 : index
    %c0_115 = arith.constant 0 : index
    %107 = vector.load %arg6[%c60, %c0_115] : memref<100x40xf32, #tpu.memory_space<vmem>>, vector<20x40xf32>
    %cst_116 = arith.constant dense<0.000000e+00> : vector<6x40xf32>
    %108 = tpu.matmul %106, %107, %cst_116 {dimension_numbers = #tpu.dot_dimension_numbers<[1], [0], [0], [1], [0, 0, 1, 1], [], []>} : vector<6x20xf32>, vector<20x40xf32>, vector<6x40xf32> -> vector<6x40xf32>
    %109 = arith.addf %105, %108 : vector<6x40xf32>
    %c4_117 = arith.constant 4 : index
    %c0_118 = arith.constant 0 : index
    %110 = vector.load %arg33[%c4_117, %c0_118] : memref<10x20xf32, #tpu.memory_space<vmem>>, vector<6x20xf32>
    %c80 = arith.constant 80 : index
    %c0_119 = arith.constant 0 : index
    %111 = vector.load %arg6[%c80, %c0_119] : memref<100x40xf32, #tpu.memory_space<vmem>>, vector<20x40xf32>
    %cst_120 = arith.constant dense<0.000000e+00> : vector<6x40xf32>
    %112 = tpu.matmul %110, %111, %cst_120 {dimension_numbers = #tpu.dot_dimension_numbers<[1], [0], [0], [1], [0, 0, 1, 1], [], []>} : vector<6x20xf32>, vector<20x40xf32>, vector<6x40xf32> -> vector<6x40xf32>
    %113 = arith.addf %109, %112 : vector<6x40xf32>
    %c0_121 = arith.constant 0 : index
    %c0_122 = arith.constant 0 : index
    %114 = vector.load %arg7[%c0_121, %c0_122] : memref<4x40xf32, #tpu.memory_space<vmem>>, vector<1x40xf32>
    %115 = vector.broadcast %114 : vector<1x40xf32> to vector<6x40xf32>
    %116 = arith.mulf %113, %115 : vector<6x40xf32>
    %c1_123 = arith.constant 1 : index
    %c0_124 = arith.constant 0 : index
    %117 = vector.load %arg7[%c1_123, %c0_124] : memref<4x40xf32, #tpu.memory_space<vmem>>, vector<1x40xf32>
    %118 = vector.broadcast %117 : vector<1x40xf32> to vector<6x40xf32>
    %119 = arith.addf %116, %118 : vector<6x40xf32>
    %cst_125 = arith.constant 0.000000e+00 : f32
    %120 = vector.broadcast %cst_125 : f32 to vector<6x40xf32>
    %121 = arith.maximumf %119, %120 : vector<6x40xf32>
    %c2_126 = arith.constant 2 : index
    %c0_127 = arith.constant 0 : index
    %122 = vector.load %arg7[%c2_126, %c0_127] : memref<4x40xf32, #tpu.memory_space<vmem>>, vector<1x40xf32>
    %123 = vector.broadcast %122 : vector<1x40xf32> to vector<6x40xf32>
    %124 = arith.mulf %121, %123 : vector<6x40xf32>
    %c3_128 = arith.constant 3 : index
    %c0_129 = arith.constant 0 : index
    %125 = vector.load %arg7[%c3_128, %c0_129] : memref<4x40xf32, #tpu.memory_space<vmem>>, vector<1x40xf32>
    %126 = vector.broadcast %125 : vector<1x40xf32> to vector<6x40xf32>
    %127 = arith.addf %124, %126 : vector<6x40xf32>
    %cst_130 = arith.constant 0.000000e+00 : f32
    %128 = vector.broadcast %cst_130 : f32 to vector<6x40xf32>
    %129 = arith.maximumf %127, %128 : vector<6x40xf32>
    %130 = arith.addf %94, %129 : vector<6x40xf32>
    %cst_131 = arith.constant dense<0.000000e+00> : vector<40xf32>
    %131 = vector.multi_reduction <add>, %130, %cst_131 [0] : vector<6x40xf32> to vector<40xf32>
    %132 = vector.shape_cast %131 : vector<40xf32> to vector<1x40xf32>
    %cst_132 = arith.constant 0.166666672 : f32
    %133 = vector.broadcast %cst_132 : f32 to vector<1x40xf32>
    %134 = arith.mulf %132, %133 : vector<1x40xf32>
    %c0_133 = arith.constant 0 : index
    %c0_134 = arith.constant 0 : index
    %135 = vector.load %arg8[%c0_133, %c0_134] : memref<40x50xf32, #tpu.memory_space<vmem>>, vector<40x50xf32>
    %cst_135 = arith.constant dense<0.000000e+00> : vector<1x50xf32>
    %136 = tpu.matmul %134, %135, %cst_135 {dimension_numbers = #tpu.dot_dimension_numbers<[1], [0], [0], [1], [0, 0, 1, 1], [], []>} : vector<1x40xf32>, vector<40x50xf32>, vector<1x50xf32> -> vector<1x50xf32>
    %c0_136 = arith.constant 0 : index
    %c0_137 = arith.constant 0 : index
    %137 = vector.load %arg9[%c0_136, %c0_137] : memref<2x50xf32, #tpu.memory_space<vmem>>, vector<1x50xf32>
    %138 = arith.mulf %136, %137 : vector<1x50xf32>
    %c1_138 = arith.constant 1 : index
    %c0_139 = arith.constant 0 : index
    %139 = vector.load %arg9[%c1_138, %c0_139] : memref<2x50xf32, #tpu.memory_space<vmem>>, vector<1x50xf32>
    %140 = arith.addf %138, %139 : vector<1x50xf32>
    %cst_140 = arith.constant 0.000000e+00 : f32
    %141 = vector.broadcast %cst_140 : f32 to vector<1x50xf32>
    %142 = arith.maximumf %140, %141 : vector<1x50xf32>
    %c0_141 = arith.constant 0 : index
    %c0_142 = arith.constant 0 : index
    %143 = vector.load %arg10[%c0_141, %c0_142] : memref<50x40xf32, #tpu.memory_space<vmem>>, vector<50x40xf32>
    %cst_143 = arith.constant dense<0.000000e+00> : vector<1x40xf32>
    %144 = tpu.matmul %142, %143, %cst_143 {dimension_numbers = #tpu.dot_dimension_numbers<[1], [0], [0], [1], [0, 0, 1, 1], [], []>} : vector<1x50xf32>, vector<50x40xf32>, vector<1x40xf32> -> vector<1x40xf32>
    %c0_144 = arith.constant 0 : index
    %c0_145 = arith.constant 0 : index
    %145 = vector.load %arg11[%c0_144, %c0_145] : memref<2x40xf32, #tpu.memory_space<vmem>>, vector<1x40xf32>
    %146 = arith.mulf %144, %145 : vector<1x40xf32>
    %c1_146 = arith.constant 1 : index
    %c0_147 = arith.constant 0 : index
    %147 = vector.load %arg11[%c1_146, %c0_147] : memref<2x40xf32, #tpu.memory_space<vmem>>, vector<1x40xf32>
    %148 = arith.addf %146, %147 : vector<1x40xf32>
    %cst_148 = arith.constant 0.000000e+00 : f32
    %149 = vector.broadcast %cst_148 : f32 to vector<1x40xf32>
    %150 = arith.maximumf %148, %149 : vector<1x40xf32>
    %c0_149 = arith.constant 0 : index
    %c0_150 = arith.constant 0 : index
    %151 = vector.load %arg12[%c0_149, %c0_150] : memref<40x40xf32, #tpu.memory_space<vmem>>, vector<40x40xf32>
    %cst_151 = arith.constant dense<0.000000e+00> : vector<1x40xf32>
    %152 = tpu.matmul %150, %151, %cst_151 {dimension_numbers = #tpu.dot_dimension_numbers<[1], [0], [0], [1], [0, 0, 1, 1], [], []>} : vector<1x40xf32>, vector<40x40xf32>, vector<1x40xf32> -> vector<1x40xf32>
    %c0_152 = arith.constant 0 : index
    %c0_153 = arith.constant 0 : index
    %153 = vector.load %arg13[%c0_152, %c0_153] : memref<2x40xf32, #tpu.memory_space<vmem>>, vector<1x40xf32>
    %154 = arith.mulf %152, %153 : vector<1x40xf32>
    %c1_154 = arith.constant 1 : index
    %c0_155 = arith.constant 0 : index
    %155 = vector.load %arg13[%c1_154, %c0_155] : memref<2x40xf32, #tpu.memory_space<vmem>>, vector<1x40xf32>
    %156 = arith.addf %154, %155 : vector<1x40xf32>
    %cst_156 = arith.constant 0.000000e+00 : f32
    %157 = vector.broadcast %cst_156 : f32 to vector<1x40xf32>
    %158 = arith.maximumf %156, %157 : vector<1x40xf32>
    %c0_157 = arith.constant 0 : index
    %c0_158 = arith.constant 0 : index
    %159 = vector.load %arg14[%c0_157, %c0_158] : memref<40x40xf32, #tpu.memory_space<vmem>>, vector<40x40xf32>
    %cst_159 = arith.constant dense<0.000000e+00> : vector<1x40xf32>
    %160 = tpu.matmul %150, %159, %cst_159 {dimension_numbers = #tpu.dot_dimension_numbers<[1], [0], [0], [1], [0, 0, 1, 1], [], []>} : vector<1x40xf32>, vector<40x40xf32>, vector<1x40xf32> -> vector<1x40xf32>
    %c0_160 = arith.constant 0 : index
    %c0_161 = arith.constant 0 : index
    %161 = vector.load %arg15[%c0_160, %c0_161] : memref<2x40xf32, #tpu.memory_space<vmem>>, vector<1x40xf32>
    %162 = arith.mulf %160, %161 : vector<1x40xf32>
    %c1_162 = arith.constant 1 : index
    %c0_163 = arith.constant 0 : index
    %163 = vector.load %arg15[%c1_162, %c0_163] : memref<2x40xf32, #tpu.memory_space<vmem>>, vector<1x40xf32>
    %164 = arith.addf %162, %163 : vector<1x40xf32>
    %cst_164 = arith.constant 0.000000e+00 : f32
    %165 = vector.broadcast %cst_164 : f32 to vector<1x40xf32>
    %166 = arith.maximumf %164, %165 : vector<1x40xf32>
    %167 = arith.maximumf %158, %166 : vector<1x40xf32>
    %168 = arith.subf %158, %167 : vector<1x40xf32>
    %169 = math.exp %168 : vector<1x40xf32>
    %170 = arith.subf %166, %167 : vector<1x40xf32>
    %171 = math.exp %170 : vector<1x40xf32>
    %172 = arith.addf %169, %171 : vector<1x40xf32>
    %173 = tpu.reciprocal %172 {approx = true} : vector<1x40xf32> -> vector<1x40xf32>
    %174 = arith.mulf %169, %173 : vector<1x40xf32>
    %175 = vector.broadcast %174 : vector<1x40xf32> to vector<6x40xf32>
    %176 = arith.mulf %175, %94 : vector<6x40xf32>
    %177 = arith.mulf %171, %173 : vector<1x40xf32>
    %178 = vector.broadcast %177 : vector<1x40xf32> to vector<6x40xf32>
    %179 = arith.mulf %178, %129 : vector<6x40xf32>
    %180 = arith.addf %176, %179 : vector<6x40xf32>
    %cst_165 = arith.constant -3.000000e+38 : f32
    %181 = vector.broadcast %cst_165 : f32 to vector<2x40xf32>
    %c0_166 = arith.constant 0 : index
    %c0_167 = arith.constant 0 : index
    %182 = vector.load %arg34[%c0_166, %c0_167] : memref<10x40xf32, #tpu.memory_space<vmem>>, vector<2x40xf32>
    tpu.vector_store %arg34[%c0_166, %c0_167], %181 {strides = array<i32>} : memref<10x40xf32, #tpu.memory_space<vmem>>, vector<2x40xf32>,
    %c8_168 = arith.constant 8 : index
    %c0_169 = arith.constant 0 : index
    %183 = vector.load %arg34[%c8_168, %c0_169] : memref<10x40xf32, #tpu.memory_space<vmem>>, vector<2x40xf32>
    tpu.vector_store %arg34[%c8_168, %c0_169], %181 {strides = array<i32>} : memref<10x40xf32, #tpu.memory_space<vmem>>, vector<2x40xf32>,
    %c2_170 = arith.constant 2 : index
    %c0_171 = arith.constant 0 : index
    %184 = vector.load %arg34[%c2_170, %c0_171] : memref<10x40xf32, #tpu.memory_space<vmem>>, vector<6x40xf32>
    tpu.vector_store %arg34[%c2_170, %c0_171], %180 {strides = array<i32>} : memref<10x40xf32, #tpu.memory_space<vmem>>, vector<6x40xf32>,
    %cst_172 = arith.constant 0.000000e+00 : f32
    %185 = vector.broadcast %cst_172 : f32 to vector<2x40xf32>
    %c0_173 = arith.constant 0 : index
    %c0_174 = arith.constant 0 : index
    %186 = vector.load %arg35[%c0_173, %c0_174] : memref<7x40xf32, #tpu.memory_space<vmem>>, vector<2x40xf32>
    tpu.vector_store %arg35[%c0_173, %c0_174], %185 {strides = array<i32>} : memref<7x40xf32, #tpu.memory_space<vmem>>, vector<2x40xf32>,
    %c5_175 = arith.constant 5 : index
    %c0_176 = arith.constant 0 : index
    %187 = vector.load %arg35[%c5_175, %c0_176] : memref<7x40xf32, #tpu.memory_space<vmem>>, vector<2x40xf32>
    tpu.vector_store %arg35[%c5_175, %c0_176], %185 {strides = array<i32>} : memref<7x40xf32, #tpu.memory_space<vmem>>, vector<2x40xf32>,
    %c0_177 = arith.constant 0 : index
    %c0_178 = arith.constant 0 : index
    %188 = vector.load %arg34[%c0_177, %c0_178] : memref<10x40xf32, #tpu.memory_space<vmem>>, vector<1x40xf32>
    %c1_179 = arith.constant 1 : index
    %c0_180 = arith.constant 0 : index
    %189 = vector.load %arg34[%c1_179, %c0_180] : memref<10x40xf32, #tpu.memory_space<vmem>>, vector<1x40xf32>
    %190 = arith.maximumf %188, %189 : vector<1x40xf32>
    %c2_181 = arith.constant 2 : index
    %c0_182 = arith.constant 0 : index
    %191 = vector.load %arg34[%c2_181, %c0_182] : memref<10x40xf32, #tpu.memory_space<vmem>>, vector<1x40xf32>
    %192 = arith.maximumf %190, %191 : vector<1x40xf32>
    %c3_183 = arith.constant 3 : index
    %c0_184 = arith.constant 0 : index
    %193 = vector.load %arg34[%c3_183, %c0_184] : memref<10x40xf32, #tpu.memory_space<vmem>>, vector<1x40xf32>
    %194 = arith.maximumf %192, %193 : vector<1x40xf32>
    %c4_185 = arith.constant 4 : index
    %c0_186 = arith.constant 0 : index
    %195 = vector.load %arg34[%c4_185, %c0_186] : memref<10x40xf32, #tpu.memory_space<vmem>>, vector<1x40xf32>
    %196 = arith.maximumf %194, %195 : vector<1x40xf32>
    %c2_187 = arith.constant 2 : index
    %c0_188 = arith.constant 0 : index
    %197 = vector.load %arg35[%c2_187, %c0_188] : memref<7x40xf32, #tpu.memory_space<vmem>>, vector<1x40xf32>
    tpu.vector_store %arg35[%c2_187, %c0_188], %196 {strides = array<i32>} : memref<7x40xf32, #tpu.memory_space<vmem>>, vector<1x40xf32>,
    %c2_189 = arith.constant 2 : index
    %c0_190 = arith.constant 0 : index
    %198 = vector.load %arg34[%c2_189, %c0_190] : memref<10x40xf32, #tpu.memory_space<vmem>>, vector<1x40xf32>
    %c3_191 = arith.constant 3 : index
    %c0_192 = arith.constant 0 : index
    %199 = vector.load %arg34[%c3_191, %c0_192] : memref<10x40xf32, #tpu.memory_space<vmem>>, vector<1x40xf32>
    %200 = arith.maximumf %198, %199 : vector<1x40xf32>
    %c4_193 = arith.constant 4 : index
    %c0_194 = arith.constant 0 : index
    %201 = vector.load %arg34[%c4_193, %c0_194] : memref<10x40xf32, #tpu.memory_space<vmem>>, vector<1x40xf32>
    %202 = arith.maximumf %200, %201 : vector<1x40xf32>
    %c5_195 = arith.constant 5 : index
    %c0_196 = arith.constant 0 : index
    %203 = vector.load %arg34[%c5_195, %c0_196] : memref<10x40xf32, #tpu.memory_space<vmem>>, vector<1x40xf32>
    %204 = arith.maximumf %202, %203 : vector<1x40xf32>
    %c6_197 = arith.constant 6 : index
    %c0_198 = arith.constant 0 : index
    %205 = vector.load %arg34[%c6_197, %c0_198] : memref<10x40xf32, #tpu.memory_space<vmem>>, vector<1x40xf32>
    %206 = arith.maximumf %204, %205 : vector<1x40xf32>
    %c3_199 = arith.constant 3 : index
    %c0_200 = arith.constant 0 : index
    %207 = vector.load %arg35[%c3_199, %c0_200] : memref<7x40xf32, #tpu.memory_space<vmem>>, vector<1x40xf32>
    tpu.vector_store %arg35[%c3_199, %c0_200], %206 {strides = array<i32>} : memref<7x40xf32, #tpu.memory_space<vmem>>, vector<1x40xf32>,
    %c4_201 = arith.constant 4 : index
    %c0_202 = arith.constant 0 : index
    %208 = vector.load %arg34[%c4_201, %c0_202] : memref<10x40xf32, #tpu.memory_space<vmem>>, vector<1x40xf32>
    %c5_203 = arith.constant 5 : index
    %c0_204 = arith.constant 0 : index
    %209 = vector.load %arg34[%c5_203, %c0_204] : memref<10x40xf32, #tpu.memory_space<vmem>>, vector<1x40xf32>
    %210 = arith.maximumf %208, %209 : vector<1x40xf32>
    %c6_205 = arith.constant 6 : index
    %c0_206 = arith.constant 0 : index
    %211 = vector.load %arg34[%c6_205, %c0_206] : memref<10x40xf32, #tpu.memory_space<vmem>>, vector<1x40xf32>
    %212 = arith.maximumf %210, %211 : vector<1x40xf32>
    %c7_207 = arith.constant 7 : index
    %c0_208 = arith.constant 0 : index
    %213 = vector.load %arg34[%c7_207, %c0_208] : memref<10x40xf32, #tpu.memory_space<vmem>>, vector<1x40xf32>
    %214 = arith.maximumf %212, %213 : vector<1x40xf32>
    %c8_209 = arith.constant 8 : index
    %c0_210 = arith.constant 0 : index
    %215 = vector.load %arg34[%c8_209, %c0_210] : memref<10x40xf32, #tpu.memory_space<vmem>>, vector<1x40xf32>
    %216 = arith.maximumf %214, %215 : vector<1x40xf32>
    %c4_211 = arith.constant 4 : index
    %c0_212 = arith.constant 0 : index
    %217 = vector.load %arg35[%c4_211, %c0_212] : memref<7x40xf32, #tpu.memory_space<vmem>>, vector<1x40xf32>
    tpu.vector_store %arg35[%c4_211, %c0_212], %216 {strides = array<i32>} : memref<7x40xf32, #tpu.memory_space<vmem>>, vector<1x40xf32>,
    %c1_213 = arith.constant 1 : index
    %c0_214 = arith.constant 0 : index
    %218 = vector.load %arg35[%c1_213, %c0_214] : memref<7x40xf32, #tpu.memory_space<vmem>>, vector<3x40xf32>
    %c0_215 = arith.constant 0 : index
    %c0_216 = arith.constant 0 : index
    %219 = vector.load %arg16[%c0_215, %c0_216] : memref<120x80xf32, #tpu.memory_space<vmem>>, vector<40x80xf32>
    %cst_217 = arith.constant dense<0.000000e+00> : vector<3x80xf32>
    %220 = tpu.matmul %218, %219, %cst_217 {dimension_numbers = #tpu.dot_dimension_numbers<[1], [0], [0], [1], [0, 0, 1, 1], [], []>} : vector<3x40xf32>, vector<40x80xf32>, vector<3x80xf32> -> vector<3x80xf32>
    %c2_218 = arith.constant 2 : index
    %c0_219 = arith.constant 0 : index
    %221 = vector.load %arg35[%c2_218, %c0_219] : memref<7x40xf32, #tpu.memory_space<vmem>>, vector<3x40xf32>
    %c40_220 = arith.constant 40 : index
    %c0_221 = arith.constant 0 : index
    %222 = vector.load %arg16[%c40_220, %c0_221] : memref<120x80xf32, #tpu.memory_space<vmem>>, vector<40x80xf32>
    %cst_222 = arith.constant dense<0.000000e+00> : vector<3x80xf32>
    %223 = tpu.matmul %221, %222, %cst_222 {dimension_numbers = #tpu.dot_dimension_numbers<[1], [0], [0], [1], [0, 0, 1, 1], [], []>} : vector<3x40xf32>, vector<40x80xf32>, vector<3x80xf32> -> vector<3x80xf32>
    %224 = arith.addf %220, %223 : vector<3x80xf32>
    %c3_223 = arith.constant 3 : index
    %c0_224 = arith.constant 0 : index
    %225 = vector.load %arg35[%c3_223, %c0_224] : memref<7x40xf32, #tpu.memory_space<vmem>>, vector<3x40xf32>
    %c80_225 = arith.constant 80 : index
    %c0_226 = arith.constant 0 : index
    %226 = vector.load %arg16[%c80_225, %c0_226] : memref<120x80xf32, #tpu.memory_space<vmem>>, vector<40x80xf32>
    %cst_227 = arith.constant dense<0.000000e+00> : vector<3x80xf32>
    %227 = tpu.matmul %225, %226, %cst_227 {dimension_numbers = #tpu.dot_dimension_numbers<[1], [0], [0], [1], [0, 0, 1, 1], [], []>} : vector<3x40xf32>, vector<40x80xf32>, vector<3x80xf32> -> vector<3x80xf32>
    %228 = arith.addf %224, %227 : vector<3x80xf32>
    %c0_228 = arith.constant 0 : index
    %c0_229 = arith.constant 0 : index
    %229 = vector.load %arg17[%c0_228, %c0_229] : memref<4x80xf32, #tpu.memory_space<vmem>>, vector<1x80xf32>
    %230 = vector.broadcast %229 : vector<1x80xf32> to vector<3x80xf32>
    %231 = arith.mulf %228, %230 : vector<3x80xf32>
    %c1_230 = arith.constant 1 : index
    %c0_231 = arith.constant 0 : index
    %232 = vector.load %arg17[%c1_230, %c0_231] : memref<4x80xf32, #tpu.memory_space<vmem>>, vector<1x80xf32>
    %233 = vector.broadcast %232 : vector<1x80xf32> to vector<3x80xf32>
    %234 = arith.addf %231, %233 : vector<3x80xf32>
    %cst_232 = arith.constant 0.000000e+00 : f32
    %235 = vector.broadcast %cst_232 : f32 to vector<3x80xf32>
    %236 = arith.maximumf %234, %235 : vector<3x80xf32>
    %c2_233 = arith.constant 2 : index
    %c0_234 = arith.constant 0 : index
    %237 = vector.load %arg17[%c2_233, %c0_234] : memref<4x80xf32, #tpu.memory_space<vmem>>, vector<1x80xf32>
    %238 = vector.broadcast %237 : vector<1x80xf32> to vector<3x80xf32>
    %239 = arith.mulf %236, %238 : vector<3x80xf32>
    %c3_235 = arith.constant 3 : index
    %c0_236 = arith.constant 0 : index
    %240 = vector.load %arg17[%c3_235, %c0_236] : memref<4x80xf32, #tpu.memory_space<vmem>>, vector<1x80xf32>
    %241 = vector.broadcast %240 : vector<1x80xf32> to vector<3x80xf32>
    %242 = arith.addf %239, %241 : vector<3x80xf32>
    %cst_237 = arith.constant 0.000000e+00 : f32
    %243 = vector.broadcast %cst_237 : f32 to vector<3x80xf32>
    %244 = arith.maximumf %242, %243 : vector<3x80xf32>
    %c0_238 = arith.constant 0 : index
    %c0_239 = arith.constant 0 : index
    %245 = vector.load %arg35[%c0_238, %c0_239] : memref<7x40xf32, #tpu.memory_space<vmem>>, vector<3x40xf32>
    %c0_240 = arith.constant 0 : index
    %c0_241 = arith.constant 0 : index
    %246 = vector.load %arg18[%c0_240, %c0_241] : memref<200x80xf32, #tpu.memory_space<vmem>>, vector<40x80xf32>
    %cst_242 = arith.constant dense<0.000000e+00> : vector<3x80xf32>
    %247 = tpu.matmul %245, %246, %cst_242 {dimension_numbers = #tpu.dot_dimension_numbers<[1], [0], [0], [1], [0, 0, 1, 1], [], []>} : vector<3x40xf32>, vector<40x80xf32>, vector<3x80xf32> -> vector<3x80xf32>
    %c1_243 = arith.constant 1 : index
    %c0_244 = arith.constant 0 : index
    %248 = vector.load %arg35[%c1_243, %c0_244] : memref<7x40xf32, #tpu.memory_space<vmem>>, vector<3x40xf32>
    %c40_245 = arith.constant 40 : index
    %c0_246 = arith.constant 0 : index
    %249 = vector.load %arg18[%c40_245, %c0_246] : memref<200x80xf32, #tpu.memory_space<vmem>>, vector<40x80xf32>
    %cst_247 = arith.constant dense<0.000000e+00> : vector<3x80xf32>
    %250 = tpu.matmul %248, %249, %cst_247 {dimension_numbers = #tpu.dot_dimension_numbers<[1], [0], [0], [1], [0, 0, 1, 1], [], []>} : vector<3x40xf32>, vector<40x80xf32>, vector<3x80xf32> -> vector<3x80xf32>
    %251 = arith.addf %247, %250 : vector<3x80xf32>
    %c2_248 = arith.constant 2 : index
    %c0_249 = arith.constant 0 : index
    %252 = vector.load %arg35[%c2_248, %c0_249] : memref<7x40xf32, #tpu.memory_space<vmem>>, vector<3x40xf32>
    %c80_250 = arith.constant 80 : index
    %c0_251 = arith.constant 0 : index
    %253 = vector.load %arg18[%c80_250, %c0_251] : memref<200x80xf32, #tpu.memory_space<vmem>>, vector<40x80xf32>
    %cst_252 = arith.constant dense<0.000000e+00> : vector<3x80xf32>
    %254 = tpu.matmul %252, %253, %cst_252 {dimension_numbers = #tpu.dot_dimension_numbers<[1], [0], [0], [1], [0, 0, 1, 1], [], []>} : vector<3x40xf32>, vector<40x80xf32>, vector<3x80xf32> -> vector<3x80xf32>
    %255 = arith.addf %251, %254 : vector<3x80xf32>
    %c3_253 = arith.constant 3 : index
    %c0_254 = arith.constant 0 : index
    %256 = vector.load %arg35[%c3_253, %c0_254] : memref<7x40xf32, #tpu.memory_space<vmem>>, vector<3x40xf32>
    %c120 = arith.constant 120 : index
    %c0_255 = arith.constant 0 : index
    %257 = vector.load %arg18[%c120, %c0_255] : memref<200x80xf32, #tpu.memory_space<vmem>>, vector<40x80xf32>
    %cst_256 = arith.constant dense<0.000000e+00> : vector<3x80xf32>
    %258 = tpu.matmul %256, %257, %cst_256 {dimension_numbers = #tpu.dot_dimension_numbers<[1], [0], [0], [1], [0, 0, 1, 1], [], []>} : vector<3x40xf32>, vector<40x80xf32>, vector<3x80xf32> -> vector<3x80xf32>
    %259 = arith.addf %255, %258 : vector<3x80xf32>
    %c4_257 = arith.constant 4 : index
    %c0_258 = arith.constant 0 : index
    %260 = vector.load %arg35[%c4_257, %c0_258] : memref<7x40xf32, #tpu.memory_space<vmem>>, vector<3x40xf32>
    %c160 = arith.constant 160 : index
    %c0_259 = arith.constant 0 : index
    %261 = vector.load %arg18[%c160, %c0_259] : memref<200x80xf32, #tpu.memory_space<vmem>>, vector<40x80xf32>
    %cst_260 = arith.constant dense<0.000000e+00> : vector<3x80xf32>
    %262 = tpu.matmul %260, %261, %cst_260 {dimension_numbers = #tpu.dot_dimension_numbers<[1], [0], [0], [1], [0, 0, 1, 1], [], []>} : vector<3x40xf32>, vector<40x80xf32>, vector<3x80xf32> -> vector<3x80xf32>
    %263 = arith.addf %259, %262 : vector<3x80xf32>
    %c0_261 = arith.constant 0 : index
    %c0_262 = arith.constant 0 : index
    %264 = vector.load %arg19[%c0_261, %c0_262] : memref<4x80xf32, #tpu.memory_space<vmem>>, vector<1x80xf32>
    %265 = vector.broadcast %264 : vector<1x80xf32> to vector<3x80xf32>
    %266 = arith.mulf %263, %265 : vector<3x80xf32>
    %c1_263 = arith.constant 1 : index
    %c0_264 = arith.constant 0 : index
    %267 = vector.load %arg19[%c1_263, %c0_264] : memref<4x80xf32, #tpu.memory_space<vmem>>, vector<1x80xf32>
    %268 = vector.broadcast %267 : vector<1x80xf32> to vector<3x80xf32>
    %269 = arith.addf %266, %268 : vector<3x80xf32>
    %cst_265 = arith.constant 0.000000e+00 : f32
    %270 = vector.broadcast %cst_265 : f32 to vector<3x80xf32>
    %271 = arith.maximumf %269, %270 : vector<3x80xf32>
    %c2_266 = arith.constant 2 : index
    %c0_267 = arith.constant 0 : index
    %272 = vector.load %arg19[%c2_266, %c0_267] : memref<4x80xf32, #tpu.memory_space<vmem>>, vector<1x80xf32>
    %273 = vector.broadcast %272 : vector<1x80xf32> to vector<3x80xf32>
    %274 = arith.mulf %271, %273 : vector<3x80xf32>
    %c3_268 = arith.constant 3 : index
    %c0_269 = arith.constant 0 : index
    %275 = vector.load %arg19[%c3_268, %c0_269] : memref<4x80xf32, #tpu.memory_space<vmem>>, vector<1x80xf32>
    %276 = vector.broadcast %275 : vector<1x80xf32> to vector<3x80xf32>
    %277 = arith.addf %274, %276 : vector<3x80xf32>
    %cst_270 = arith.constant 0.000000e+00 : f32
    %278 = vector.broadcast %cst_270 : f32 to vector<3x80xf32>
    %279 = arith.maximumf %277, %278 : vector<3x80xf32>
    %280 = arith.addf %244, %279 : vector<3x80xf32>
    %cst_271 = arith.constant dense<0.000000e+00> : vector<80xf32>
    %281 = vector.multi_reduction <add>, %280, %cst_271 [0] : vector<3x80xf32> to vector<80xf32>
    %282 = vector.shape_cast %281 : vector<80xf32> to vector<1x80xf32>
    %cst_272 = arith.constant 0.333333343 : f32
    %283 = vector.broadcast %cst_272 : f32 to vector<1x80xf32>
    %284 = arith.mulf %282, %283 : vector<1x80xf32>
    %c0_273 = arith.constant 0 : index
    %c0_274 = arith.constant 0 : index
    %285 = vector.load %arg20[%c0_273, %c0_274] : memref<80x50xf32, #tpu.memory_space<vmem>>, vector<80x50xf32>
    %cst_275 = arith.constant dense<0.000000e+00> : vector<1x50xf32>
    %286 = tpu.matmul %284, %285, %cst_275 {dimension_numbers = #tpu.dot_dimension_numbers<[1], [0], [0], [1], [0, 0, 1, 1], [], []>} : vector<1x80xf32>, vector<80x50xf32>, vector<1x50xf32> -> vector<1x50xf32>
    %c0_276 = arith.constant 0 : index
    %c0_277 = arith.constant 0 : index
    %287 = vector.load %arg21[%c0_276, %c0_277] : memref<2x50xf32, #tpu.memory_space<vmem>>, vector<1x50xf32>
    %288 = arith.mulf %286, %287 : vector<1x50xf32>
    %c1_278 = arith.constant 1 : index
    %c0_279 = arith.constant 0 : index
    %289 = vector.load %arg21[%c1_278, %c0_279] : memref<2x50xf32, #tpu.memory_space<vmem>>, vector<1x50xf32>
    %290 = arith.addf %288, %289 : vector<1x50xf32>
    %cst_280 = arith.constant 0.000000e+00 : f32
    %291 = vector.broadcast %cst_280 : f32 to vector<1x50xf32>
    %292 = arith.maximumf %290, %291 : vector<1x50xf32>
    %c0_281 = arith.constant 0 : index
    %c0_282 = arith.constant 0 : index
    %293 = vector.load %arg22[%c0_281, %c0_282] : memref<50x80xf32, #tpu.memory_space<vmem>>, vector<50x80xf32>
    %cst_283 = arith.constant dense<0.000000e+00> : vector<1x80xf32>
    %294 = tpu.matmul %292, %293, %cst_283 {dimension_numbers = #tpu.dot_dimension_numbers<[1], [0], [0], [1], [0, 0, 1, 1], [], []>} : vector<1x50xf32>, vector<50x80xf32>, vector<1x80xf32> -> vector<1x80xf32>
    %c0_284 = arith.constant 0 : index
    %c0_285 = arith.constant 0 : index
    %295 = vector.load %arg23[%c0_284, %c0_285] : memref<2x80xf32, #tpu.memory_space<vmem>>, vector<1x80xf32>
    %296 = arith.mulf %294, %295 : vector<1x80xf32>
    %c1_286 = arith.constant 1 : index
    %c0_287 = arith.constant 0 : index
    %297 = vector.load %arg23[%c1_286, %c0_287] : memref<2x80xf32, #tpu.memory_space<vmem>>, vector<1x80xf32>
    %298 = arith.addf %296, %297 : vector<1x80xf32>
    %cst_288 = arith.constant 0.000000e+00 : f32
    %299 = vector.broadcast %cst_288 : f32 to vector<1x80xf32>
    %300 = arith.maximumf %298, %299 : vector<1x80xf32>
    %c0_289 = arith.constant 0 : index
    %c0_290 = arith.constant 0 : index
    %301 = vector.load %arg24[%c0_289, %c0_290] : memref<80x80xf32, #tpu.memory_space<vmem>>, vector<80x80xf32>
    %cst_291 = arith.constant dense<0.000000e+00> : vector<1x80xf32>
    %302 = tpu.matmul %300, %301, %cst_291 {dimension_numbers = #tpu.dot_dimension_numbers<[1], [0], [0], [1], [0, 0, 1, 1], [], []>} : vector<1x80xf32>, vector<80x80xf32>, vector<1x80xf32> -> vector<1x80xf32>
    %c0_292 = arith.constant 0 : index
    %c0_293 = arith.constant 0 : index
    %303 = vector.load %arg25[%c0_292, %c0_293] : memref<2x80xf32, #tpu.memory_space<vmem>>, vector<1x80xf32>
    %304 = arith.mulf %302, %303 : vector<1x80xf32>
    %c1_294 = arith.constant 1 : index
    %c0_295 = arith.constant 0 : index
    %305 = vector.load %arg25[%c1_294, %c0_295] : memref<2x80xf32, #tpu.memory_space<vmem>>, vector<1x80xf32>
    %306 = arith.addf %304, %305 : vector<1x80xf32>
    %cst_296 = arith.constant 0.000000e+00 : f32
    %307 = vector.broadcast %cst_296 : f32 to vector<1x80xf32>
    %308 = arith.maximumf %306, %307 : vector<1x80xf32>
    %c0_297 = arith.constant 0 : index
    %c0_298 = arith.constant 0 : index
    %309 = vector.load %arg26[%c0_297, %c0_298] : memref<80x80xf32, #tpu.memory_space<vmem>>, vector<80x80xf32>
    %cst_299 = arith.constant dense<0.000000e+00> : vector<1x80xf32>
    %310 = tpu.matmul %300, %309, %cst_299 {dimension_numbers = #tpu.dot_dimension_numbers<[1], [0], [0], [1], [0, 0, 1, 1], [], []>} : vector<1x80xf32>, vector<80x80xf32>, vector<1x80xf32> -> vector<1x80xf32>
    %c0_300 = arith.constant 0 : index
    %c0_301 = arith.constant 0 : index
    %311 = vector.load %arg27[%c0_300, %c0_301] : memref<2x80xf32, #tpu.memory_space<vmem>>, vector<1x80xf32>
    %312 = arith.mulf %310, %311 : vector<1x80xf32>
    %c1_302 = arith.constant 1 : index
    %c0_303 = arith.constant 0 : index
    %313 = vector.load %arg27[%c1_302, %c0_303] : memref<2x80xf32, #tpu.memory_space<vmem>>, vector<1x80xf32>
    %314 = arith.addf %312, %313 : vector<1x80xf32>
    %cst_304 = arith.constant 0.000000e+00 : f32
    %315 = vector.broadcast %cst_304 : f32 to vector<1x80xf32>
    %316 = arith.maximumf %314, %315 : vector<1x80xf32>
    %317 = arith.maximumf %308, %316 : vector<1x80xf32>
    %318 = arith.subf %308, %317 : vector<1x80xf32>
    %319 = math.exp %318 : vector<1x80xf32>
    %320 = arith.subf %316, %317 : vector<1x80xf32>
    %321 = math.exp %320 : vector<1x80xf32>
    %322 = arith.addf %319, %321 : vector<1x80xf32>
    %323 = tpu.reciprocal %322 {approx = true} : vector<1x80xf32> -> vector<1x80xf32>
    %324 = arith.mulf %319, %323 : vector<1x80xf32>
    %325 = vector.broadcast %324 : vector<1x80xf32> to vector<3x80xf32>
    %326 = arith.mulf %325, %244 : vector<3x80xf32>
    %327 = arith.mulf %321, %323 : vector<1x80xf32>
    %328 = vector.broadcast %327 : vector<1x80xf32> to vector<3x80xf32>
    %329 = arith.mulf %328, %279 : vector<3x80xf32>
    %330 = arith.addf %326, %329 : vector<3x80xf32>
    %c0_305 = arith.constant 0 : index
    %c0_306 = arith.constant 0 : index
    %331 = vector.load %arg29[%c0_305, %c0_306] : memref<1x5xf32, #tpu.memory_space<vmem>>, vector<1x5xf32>
    %332 = vector.extract_strided_slice %330 {offsets = [0, 0], sizes = [1, 80], strides = [1, 1]} : vector<3x80xf32> to vector<1x80xf32>
    %c0_307 = arith.constant 0 : index
    %c0_308 = arith.constant 0 : index
    %333 = vector.load %arg28[%c0_307, %c0_308] : memref<240x5xf32, #tpu.memory_space<vmem>>, vector<80x5xf32>
    %cst_309 = arith.constant dense<0.000000e+00> : vector<1x5xf32>
    %334 = tpu.matmul %332, %333, %cst_309 {dimension_numbers = #tpu.dot_dimension_numbers<[1], [0], [0], [1], [0, 0, 1, 1], [], []>} : vector<1x80xf32>, vector<80x5xf32>, vector<1x5xf32> -> vector<1x5xf32>
    %335 = arith.addf %331, %334 : vector<1x5xf32>
    %336 = vector.extract_strided_slice %330 {offsets = [1, 0], sizes = [1, 80], strides = [1, 1]} : vector<3x80xf32> to vector<1x80xf32>
    %c80_310 = arith.constant 80 : index
    %c0_311 = arith.constant 0 : index
    %337 = vector.load %arg28[%c80_310, %c0_311] : memref<240x5xf32, #tpu.memory_space<vmem>>, vector<80x5xf32>
    %cst_312 = arith.constant dense<0.000000e+00> : vector<1x5xf32>
    %338 = tpu.matmul %336, %337, %cst_312 {dimension_numbers = #tpu.dot_dimension_numbers<[1], [0], [0], [1], [0, 0, 1, 1], [], []>} : vector<1x80xf32>, vector<80x5xf32>, vector<1x5xf32> -> vector<1x5xf32>
    %339 = arith.addf %335, %338 : vector<1x5xf32>
    %340 = vector.extract_strided_slice %330 {offsets = [2, 0], sizes = [1, 80], strides = [1, 1]} : vector<3x80xf32> to vector<1x80xf32>
    %c160_313 = arith.constant 160 : index
    %c0_314 = arith.constant 0 : index
    %341 = vector.load %arg28[%c160_313, %c0_314] : memref<240x5xf32, #tpu.memory_space<vmem>>, vector<80x5xf32>
    %cst_315 = arith.constant dense<0.000000e+00> : vector<1x5xf32>
    %342 = tpu.matmul %340, %341, %cst_315 {dimension_numbers = #tpu.dot_dimension_numbers<[1], [0], [0], [1], [0, 0, 1, 1], [], []>} : vector<1x80xf32>, vector<80x5xf32>, vector<1x5xf32> -> vector<1x5xf32>
    %343 = arith.addf %339, %342 : vector<1x5xf32>
    %cst_316 = arith.constant dense<0xFF800000> : vector<1xf32>
    %344 = vector.multi_reduction <maximumf>, %343, %cst_316 [1] : vector<1x5xf32> to vector<1xf32>
    %345 = vector.shape_cast %344 : vector<1xf32> to vector<1x1xf32>
    %346 = vector.broadcast %345 : vector<1x1xf32> to vector<1x5xf32>
    %347 = arith.subf %343, %346 : vector<1x5xf32>
    %348 = math.exp %347 : vector<1x5xf32>
    %cst_317 = arith.constant dense<0.000000e+00> : vector<1xf32>
    %349 = vector.multi_reduction <add>, %348, %cst_317 [1] : vector<1x5xf32> to vector<1xf32>
    %350 = vector.shape_cast %349 : vector<1xf32> to vector<1x1xf32>
    %cst_318 = arith.constant 1.000000e+00 : f32
    %351 = vector.broadcast %cst_318 : f32 to vector<1x1xf32>
    %352 = arith.divf %351, %350 : vector<1x1xf32>
    %353 = vector.broadcast %352 : vector<1x1xf32> to vector<1x5xf32>
    %354 = arith.mulf %348, %353 : vector<1x5xf32>
    %c0_319 = arith.constant 0 : index
    %c0_320 = arith.constant 0 : index
    %c0_321 = arith.constant 0 : index
    %355 = vector.load %arg30[%c0_319, %c0_320, %c0_321] : memref<1x1x5xf32, #tpu.memory_space<vmem>>, vector<1x1x5xf32>
    %356 = vector.shape_cast %355 : vector<1x1x5xf32> to vector<1x5xf32>
    %357 = vector.shape_cast %354 : vector<1x5xf32> to vector<1x1x5xf32>
    tpu.vector_store %arg30[%c0_319, %c0_320, %c0_321], %357 {strides = array<i32>} : memref<1x1x5xf32, #tpu.memory_space<vmem>>, vector<1x1x5xf32>,
    return
  }
  func.func @transform_0(%arg0: i32) -> (i32, i32, i32) {
    %c0_i32 = arith.constant 0 : i32
    %c0_i32_0 = arith.constant 0 : i32
    %c0_i32_1 = arith.constant 0 : i32
    return %arg0, %c0_i32, %c0_i32_0 : i32, i32, i32
  }
  func.func @transform_1(%arg0: i32) -> (i32, i32) {
    %c0_i32 = arith.constant 0 : i32
    %c0_i32_0 = arith.constant 0 : i32
    %c0_i32_1 = arith.constant 0 : i32
    return %c0_i32, %c0_i32_0 : i32, i32
  }
  func.func @transform_2(%arg0: i32) -> (i32, i32) {
    %c0_i32 = arith.constant 0 : i32
    %c0_i32_0 = arith.constant 0 : i32
    %c0_i32_1 = arith.constant 0 : i32
    return %c0_i32, %c0_i32_0 : i32, i32
  }
  func.func @transform_3(%arg0: i32) -> (i32, i32) {
    %c0_i32 = arith.constant 0 : i32
    %c0_i32_0 = arith.constant 0 : i32
    %c0_i32_1 = arith.constant 0 : i32
    return %c0_i32, %c0_i32_0 : i32, i32
  }
  func.func @transform_4(%arg0: i32) -> (i32, i32) {
    %c0_i32 = arith.constant 0 : i32
    %c0_i32_0 = arith.constant 0 : i32
    %c0_i32_1 = arith.constant 0 : i32
    return %c0_i32, %c0_i32_0 : i32, i32
  }
  func.func @transform_5(%arg0: i32) -> (i32, i32) {
    %c0_i32 = arith.constant 0 : i32
    %c0_i32_0 = arith.constant 0 : i32
    %c0_i32_1 = arith.constant 0 : i32
    return %c0_i32, %c0_i32_0 : i32, i32
  }
  func.func @transform_6(%arg0: i32) -> (i32, i32) {
    %c0_i32 = arith.constant 0 : i32
    %c0_i32_0 = arith.constant 0 : i32
    %c0_i32_1 = arith.constant 0 : i32
    return %c0_i32, %c0_i32_0 : i32, i32
  }
  func.func @transform_7(%arg0: i32) -> (i32, i32) {
    %c0_i32 = arith.constant 0 : i32
    %c0_i32_0 = arith.constant 0 : i32
    %c0_i32_1 = arith.constant 0 : i32
    return %c0_i32, %c0_i32_0 : i32, i32
  }
  func.func @transform_8(%arg0: i32) -> (i32, i32) {
    %c0_i32 = arith.constant 0 : i32
    %c0_i32_0 = arith.constant 0 : i32
    %c0_i32_1 = arith.constant 0 : i32
    return %c0_i32, %c0_i32_0 : i32, i32
  }
  func.func @transform_9(%arg0: i32) -> (i32, i32) {
    %c0_i32 = arith.constant 0 : i32
    %c0_i32_0 = arith.constant 0 : i32
    %c0_i32_1 = arith.constant 0 : i32
    return %c0_i32, %c0_i32_0 : i32, i32
  }
  func.func @transform_10(%arg0: i32) -> (i32, i32) {
    %c0_i32 = arith.constant 0 : i32
    %c0_i32_0 = arith.constant 0 : i32
    %c0_i32_1 = arith.constant 0 : i32
    return %c0_i32, %c0_i32_0 : i32, i32
  }
  func.func @transform_11(%arg0: i32) -> (i32, i32) {
    %c0_i32 = arith.constant 0 : i32
    %c0_i32_0 = arith.constant 0 : i32
    %c0_i32_1 = arith.constant 0 : i32
    return %c0_i32, %c0_i32_0 : i32, i32
  }
  func.func @transform_12(%arg0: i32) -> (i32, i32) {
    %c0_i32 = arith.constant 0 : i32
    %c0_i32_0 = arith.constant 0 : i32
    %c0_i32_1 = arith.constant 0 : i32
    return %c0_i32, %c0_i32_0 : i32, i32
  }
  func.func @transform_13(%arg0: i32) -> (i32, i32) {
    %c0_i32 = arith.constant 0 : i32
    %c0_i32_0 = arith.constant 0 : i32
    %c0_i32_1 = arith.constant 0 : i32
    return %c0_i32, %c0_i32_0 : i32, i32
  }
  func.func @transform_14(%arg0: i32) -> (i32, i32) {
    %c0_i32 = arith.constant 0 : i32
    %c0_i32_0 = arith.constant 0 : i32
    %c0_i32_1 = arith.constant 0 : i32
    return %c0_i32, %c0_i32_0 : i32, i32
  }
  func.func @transform_15(%arg0: i32) -> (i32, i32) {
    %c0_i32 = arith.constant 0 : i32
    %c0_i32_0 = arith.constant 0 : i32
    %c0_i32_1 = arith.constant 0 : i32
    return %c0_i32, %c0_i32_0 : i32, i32
  }
  func.func @transform_16(%arg0: i32) -> (i32, i32) {
    %c0_i32 = arith.constant 0 : i32
    %c0_i32_0 = arith.constant 0 : i32
    %c0_i32_1 = arith.constant 0 : i32
    return %c0_i32, %c0_i32_0 : i32, i32
  }
  func.func @transform_17(%arg0: i32) -> (i32, i32) {
    %c0_i32 = arith.constant 0 : i32
    %c0_i32_0 = arith.constant 0 : i32
    %c0_i32_1 = arith.constant 0 : i32
    return %c0_i32, %c0_i32_0 : i32, i32
  }
  func.func @transform_18(%arg0: i32) -> (i32, i32) {
    %c0_i32 = arith.constant 0 : i32
    %c0_i32_0 = arith.constant 0 : i32
    %c0_i32_1 = arith.constant 0 : i32
    return %c0_i32, %c0_i32_0 : i32, i32
  }
  func.func @transform_19(%arg0: i32) -> (i32, i32) {
    %c0_i32 = arith.constant 0 : i32
    %c0_i32_0 = arith.constant 0 : i32
    %c0_i32_1 = arith.constant 0 : i32
    return %c0_i32, %c0_i32_0 : i32, i32
  }
  func.func @transform_20(%arg0: i32) -> (i32, i32) {
    %c0_i32 = arith.constant 0 : i32
    %c0_i32_0 = arith.constant 0 : i32
    %c0_i32_1 = arith.constant 0 : i32
    return %c0_i32, %c0_i32_0 : i32, i32
  }
  func.func @transform_21(%arg0: i32) -> (i32, i32) {
    %c0_i32 = arith.constant 0 : i32
    %c0_i32_0 = arith.constant 0 : i32
    %c0_i32_1 = arith.constant 0 : i32
    return %c0_i32, %c0_i32_0 : i32, i32
  }
  func.func @transform_22(%arg0: i32) -> (i32, i32) {
    %c0_i32 = arith.constant 0 : i32
    %c0_i32_0 = arith.constant 0 : i32
    %c0_i32_1 = arith.constant 0 : i32
    return %c0_i32, %c0_i32_0 : i32, i32
  }
  func.func @transform_23(%arg0: i32) -> (i32, i32) {
    %c0_i32 = arith.constant 0 : i32
    %c0_i32_0 = arith.constant 0 : i32
    %c0_i32_1 = arith.constant 0 : i32
    return %c0_i32, %c0_i32_0 : i32, i32
  }
  func.func @transform_24(%arg0: i32) -> (i32, i32) {
    %c0_i32 = arith.constant 0 : i32
    %c0_i32_0 = arith.constant 0 : i32
    %c0_i32_1 = arith.constant 0 : i32
    return %c0_i32, %c0_i32_0 : i32, i32
  }
  func.func @transform_25(%arg0: i32) -> (i32, i32) {
    %c0_i32 = arith.constant 0 : i32
    %c0_i32_0 = arith.constant 0 : i32
    %c0_i32_1 = arith.constant 0 : i32
    return %c0_i32, %c0_i32_0 : i32, i32
  }
  func.func @transform_26(%arg0: i32) -> (i32, i32) {
    %c0_i32 = arith.constant 0 : i32
    %c0_i32_0 = arith.constant 0 : i32
    %c0_i32_1 = arith.constant 0 : i32
    return %c0_i32, %c0_i32_0 : i32, i32
  }
  func.func @transform_27(%arg0: i32) -> (i32, i32) {
    %c0_i32 = arith.constant 0 : i32
    %c0_i32_0 = arith.constant 0 : i32
    %c0_i32_1 = arith.constant 0 : i32
    return %c0_i32, %c0_i32_0 : i32, i32
  }
  func.func @transform_28(%arg0: i32) -> (i32, i32) {
    %c0_i32 = arith.constant 0 : i32
    %c0_i32_0 = arith.constant 0 : i32
    %c0_i32_1 = arith.constant 0 : i32
    return %c0_i32, %c0_i32_0 : i32, i32
  }
  func.func @transform_29(%arg0: i32) -> (i32, i32, i32) {
    %c0_i32 = arith.constant 0 : i32
    %c0_i32_0 = arith.constant 0 : i32
    %c0_i32_1 = arith.constant 0 : i32
    return %arg0, %c0_i32, %c0_i32_0 : i32, i32, i32
  }
}

</mosaic_0001>

<bundles_post_ra>
// kernel: sknet_forward.1
= control target key start
LH: loop header
LB: loop body
LE: loop exit
PB: predicated region body
PF: predicated region fallthrough
CT: control target
= control target key end

     0   :  { %s2411_s6 = smov 1   ;;  %s2412_s10 = smov 2   ;;  %s2960_s0 = inlined_call_operand.smem [shape: u32[30], index: -1, kind: input, shape index: {}] }
   0x1   :  { %s2450_s5 = sld [smem:[%s2960_s0]]   ;;  %s2413_s14 = smov 3  }
   0x2   :  { %s2455_s9 = sld [smem:[%s2960_s0 + %s2411_s6]]   ;;  %s2414_s18 = smov 4  }
   0x3   :  { %s2460_s13 = sld [smem:[%s2960_s0 + %s2412_s10]]   ;;  %s2415_s22 = smov 5  }
   0x4   :  { %s2465_s17 = sld [smem:[%s2960_s0 + %s2413_s14]]   ;;  %s2416_s26 = smov 6  }
   0x5   :  { %s2470_s21 = sld [smem:[%s2960_s0 + %s2414_s18]]   ;;  %s2417_s30 = smov 7  }
   0x6   :  { %s2475_s25 = sld [smem:[%s2960_s0 + %s2415_s22]]   ;;  %s2418_s4 = smov 8  }
   0x7   :  { %2988 = sst [smem:[#allocation10_spill]] %s2450_s5  ;;  %s2419_s10 = smov 9  }
   0x8   :  { %2989 = sst [smem:[#allocation11_spill]] %s2455_s9  ;;  %s2420_s15 = smov 10  }
   0x9   :  { %2990 = sst [smem:[#allocation12_spill]] %s2460_s13  ;;  %s2421_s20 = smov 11  }
   0xa   :  { %s2480_s29 = sld [smem:[%s2960_s0 + %s2416_s26]]   ;;  %s2422_s26 = smov 12  }
   0xb   :  { %s2485_s3 = sld [smem:[%s2960_s0 + %s2417_s30]]   ;;  %s2423_s1 = smov 13  }
   0xc   :  { %s2490_s8 = sld [smem:[%s2960_s0 + %s2418_s4]]   ;;  %s2424_s7 = smov 14  }
   0xd   :  { %s2495_s14 = sld [smem:[%s2960_s0 + %s2419_s10]]   ;;  %s2426_s22 = smov 16  }
   0xe   :  { %s2500_s19 = sld [smem:[%s2960_s0 + %s2420_s15]]   ;;  %s2425_s15 = smov 15  }
   0xf   :  { %s2505_s24 = sld [smem:[%s2960_s0 + %s2421_s20]]   ;;  %s2427_s28 = smov 17  }
  0x10   :  { %s2510_s30 = sld [smem:[%s2960_s0 + %s2422_s26]]  }
  0x11   :  { %2991 = sst [smem:[#allocation13_spill]] %s2485_s3 }
  0x12   :  { %2992 = sst [smem:[#allocation14_spill]] %s2490_s8 }
  0x13   :  { %s2515_s6 = sld [smem:[%s2960_s0 + %s2423_s1]]  }
  0x14   :  { %s2520_s12 = sld [smem:[%s2960_s0 + %s2424_s7]]   ;;  %s2428_s7 = smov 18  }
  0x15   :  { %s2525_s20 = sld [smem:[%s2960_s0 + %s2425_s15]]   ;;  %s2429_s15 = smov 19  }
  0x16   :  { %s2530_s27 = sld [smem:[%s2960_s0 + %s2426_s22]]   ;;  %s2430_s22 = smov 20  }
  0x17   :  { %s2535_s4 = sld [smem:[%s2960_s0 + %s2427_s28]]   ;;  %s2431_s28 = smov 21  }
  0x19   :  { %2993 = sst [smem:[#allocation15_spill]] %s2515_s6 }
  0x1a   :  { %2994 = sst [smem:[#allocation16_spill]] %s2520_s12 }
  0x1b   :  { %2995 = sst [smem:[#allocation17_spill]] %s2525_s20 }
  0x1c   :  { %2996 = sst [smem:[#allocation18_spill]] %s2530_s27 }
  0x1d   :  { %2997 = sst [smem:[#allocation19_spill]] %s2535_s4 }
  0x1e   :  { %s2540_s12 = sld [smem:[%s2960_s0 + %s2428_s7]]   ;;  %s2432_s7 = smov 22  }
  0x1f   :  { %s2545_s20 = sld [smem:[%s2960_s0 + %s2429_s15]]   ;;  %s2433_s15 = smov 23  }
  0x20   :  { %s2550_s27 = sld [smem:[%s2960_s0 + %s2430_s22]]   ;;  %s2434_s22 = smov 24  }
  0x21   :  { %s2555_s4 = sld [smem:[%s2960_s0 + %s2431_s28]]   ;;  %s2435_s28 = smov 25  }
  0x24   :  { %2998 = sst [smem:[#allocation20_spill]] %s2540_s12 }
  0x25   :  { %2999 = sst [smem:[#allocation21_spill]] %s2545_s20 }
  0x26   :  { %3000 = sst [smem:[#allocation22_spill]] %s2550_s27 }
  0x27   :  { %3001 = sst [smem:[#allocation23_spill]] %s2555_s4 }
  0x28   :  { %s2560_s12 = sld [smem:[%s2960_s0 + %s2432_s7]]   ;;  %s2436_s7 = smov 26  }
  0x29   :  { %s2565_s20 = sld [smem:[%s2960_s0 + %s2433_s15]]   ;;  %s2437_s15 = smov 27  }
  0x2a   :  { %s2570_s27 = sld [smem:[%s2960_s0 + %s2434_s22]]   ;;  %s2438_s22 = smov 28  }
  0x2b   :  { %s2575_s4 = sld [smem:[%s2960_s0 + %s2435_s28]]   ;;  %s2439_s28 = smov 29  }
  0x2e   :  { %3002 = sst [smem:[#allocation24_spill]] %s2560_s12 }
  0x2f   :  { %3003 = sst [smem:[#allocation25_spill]] %s2565_s20 }
  0x30   :  { %3004 = sst [smem:[#allocation26_spill]] %s2570_s27 }
  0x31   :  { %3005 = sst [smem:[#allocation27_spill]] %s2575_s4 }
  0x32   :  { %s2580_s12 = sld [smem:[%s2960_s0 + %s2436_s7]]  }
  0x33   :  { %s2585_s20 = sld [smem:[%s2960_s0 + %s2437_s15]]  }
  0x34   :  { %s2590_s27 = sld [smem:[%s2960_s0 + %s2438_s22]]  }
  0x35   :  { %s2595_s4 = sld [smem:[%s2960_s0 + %s2439_s28]]  }
  0x38   :  { %3006 = sst [smem:[#allocation28_spill]] %s2580_s12 }
  0x39   :  { %64 = vsyncpa [#allocation8], 0 }
  0x3a   :  { %66 = vsyncpa [#allocation8 + $0x1], 0  ;;  %s2597_s7 = smov 0   ;;  %s2599_s10 = smov 0  }
  0x3b   :  { %s2601_s11 = smov 0   ;;  %s2603_s15 = smov 0  }
  0x3c LB: > { %s3007_s13 = sld [smem:[#allocation12_spill]]  ;;  %s2618_s0 = sadd.s32 4294967295, %s2409_s15   ;;  %s2401_s10 = sphi %s2599_s10, %s3029_s10   ;;  %s2397_s7 = sphi %s2597_s7, %s3028_s7   ;;  %s2409_s15 = sphi %s2603_s15, %s3031_s15   ;;  %s2405_s11 = sphi %s2601_s11, %s3030_s11  }
  0x3d   : > { %s3008_s12 = sld [smem:[#allocation28_spill]]  ;;  %s2188_s16 = sadd.s32 4294967294, %s2409_s15  }
  0x3e   : > { %s3009_s9 = sld [smem:[#allocation11_spill]]  ;;  %s2622_s18 = sadd.s32 1, %s2409_s15  }
  0x3f   : > { %s3010_s8 = sld [smem:[#allocation14_spill]]  ;;  %s693_s22 = sadd.s32 1, %s2405_s11 }
  0x40   : > { %s3011_s6 = sld [smem:[#allocation15_spill]]  ;;  %s690_s23 = ssub.s32 %s2409_s15, %s2622_s18 }
  0x41   : > { %s3012_s3 = sld [smem:[#allocation13_spill]]  ;;  %p703_p0 = scmp.ne.s32.totalorder %s2405_s11, %s2401_s10 }
  0x42   : > { %p691_p1 = scmp.eq.s32.totalorder %s690_s23, 0  ;;  %p704_p2 = scmp.eq.s32.totalorder %s2618_s0, 1 }
  0x43   : > { %p709_p3 = scmp.ne.s32.totalorder %s2401_s10, %s2397_s7  ;;  %p710_p4 = scmp.eq.s32.totalorder %s2188_s16, 1 }
  0x44   : > { %s2633_s26 = scalar_select %p691_p1, %s2405_s11, %s693_s22  }
  0x45   : > { %p2635_p5 = por %p704_p2, %p703_p0  ;;  %p2639_p6 = por %p710_p4, %p709_p3 }
  0x46   : > { %p2191_p7 = scmp.ge.s32.totalorder %s2409_s15, 1  ;;  %p820_p8 = scmp.lt.s32.totalorder %s2409_s15, 3 }
  0x48   : > { %p821_p9 = pnand %p2191_p7, %p820_p8 }
  0x49   : > { %s3015_s5 = sld [smem:[#allocation10_spill]] (!%p821_p9)  ;;  %p895_p10 = scmp.lt.s32.totalorder (!%p821_p9), %s2618_s0, 1 }
  0x4a   : > { %824 = sbr.rel (%p821_p9) target bundleno = 1940 (0x794), region = 136  ;;  %s3016_s23 = sld [smem:[#allocation16_spill]] (!%p821_p9) }
  0x4f   : > { %vm921_vm0 = vcmask 1043456   ;;  %v982_v0 = vld [vmem:[%s3009_s9 + $0x8] sm:$0xf]  ;;  %v914_v1 = vld [vmem:[%s3009_s9 + $0x4] sm:$0xf]  ;;  %vm900_vm1 = vcmask 24576  }
  0x50   : > { %2200 = vmatpush.msk.msra.mxu2 %vm921_vm0, %v982_v0  ;;  %v911_v2 = vld [vmem:[%s3009_s9] sm:$0xf]  ;;  %s896_s2 = scalar_select %p895_p10, %s2618_s0, 1  ;;  %vm905_vm2 = vcmask 31744   ;;  %2194 = vmatpush.msk.msra.mxu0 %vm921_vm0, %v914_v1  ;;  %v2440_v3 = vmov 0.0   ;;  %vm907_vm3 = vcmask 27648  }
  0x51   : > { %2197 = vmatpush.msk.msra.mxu1 %vm921_vm0, %v911_v2  ;;  %901 = vst.msk [vmem:[#allocation2] sm:$0x1] %vm900_vm1, %v2440_v3  ;;  %vm1027_vm4 = vcmask 155648   ;;  %v2441_v12 = vmov -3e+38   ;;  %v1180_v14 = vld [vmem:[%s2475_s25 + $0x8] sm:$0xff] }
  0x52   : > { %902 = vst.msk [vmem:[#allocation2 + $0xd] sm:$0x1] %vm900_vm1, %v2440_v3  ;;  %s2242_s16 = sshll.u32 %s896_s2, 4  ;;  %v1181_v13 = vld [vmem:[%s2475_s25 + $0x10] sm:$0xf]  ;;  %vm1034_vm5 = vcmask 156672  }
  0x53   : > { %s899_s22 = scalar_lea.vmem %s3015_s5, %s2242_s16  ;;  %1028 = vst.msk [vmem:[#allocation3] sm:$0x1] %vm1027_vm4, %v2441_v12  ;;  %2211 = vmatpush.msk.msrb.mxu2 %vm921_vm0, %v1181_v13  ;;  %v1179_v15 = vld [vmem:[%s2475_s25] sm:$0xff]  ;;  %vm1496_vm6 = vcmask 320512   ;;  %v1136_v23 = vld [vmem:[%s2465_s17 + $0x38] sm:$0xf] }
  0x54   : > { %v903_v4 = vld [vmem:[%s899_s22] sm:$0xff]  ;;  %v904_v5 = vld [vmem:[%s899_s22 + $0x8] sm:$0xf]  ;;  %1035 = vst.msk [vmem:[#allocation4] sm:$0x3] %vm1034_vm5, %v2440_v3  ;;  %2207 = vmatpush.msk.msrb.mxu0 %vm921_vm0, %v1136_v23  ;;  %v1135_v27 = vld [vmem:[%s2465_s17 + $0x30] sm:$0xff] }
  0x55   : > { %906 = vst.msk [vmem:[#allocation2 + $0x1] sm:$0xff] %vm905_vm2, %v903_v4  ;;  %1228 = vmatpush.msrb.mxu2 %v1180_v14  ;;  %v2313_v19 = vld [vmem:[%s3007_s13] ss:$0 sm:$0xff]  ;;  %v2314_v20 = vld [vmem:[%s3007_s13 + $0x1] ss:$0 sm:$0xff]  ;;  %v1078_v31 = vld [vmem:[%s2465_s17 + $0x14] sm:$0xff] }
  0x56   : > { %908 = vst.msk [vmem:[#allocation2 + $0x9] sm:$0xf] %vm907_vm3, %v904_v5  ;;  %v1080_v22 = vld [vmem:[%s2465_s17 + $0x24] sm:$0xf]  ;;  %v1079_v24 = vld [vmem:[%s2465_s17 + $0x1c] sm:$0xff]  ;;  %v1134_v32 = vld [vmem:[%s2465_s17 + $0x28] sm:$0xff]  ;;  %1157 = vmatpush.msrb.mxu0 %v1135_v27 }
  0x57   : > { %1036 = vst.msk [vmem:[#allocation4 + $0x8] sm:$0x3] %vm1034_vm5, %v2440_v3  ;;  %1229 = vmatpush.msrb.mxu2 %v1179_v15  ;;  %2203 = vmatpush.msk.msra.mxu3 %vm921_vm0, %v1080_v22  ;;  %v1184_v26 = vld [vmem:[%s2475_s25 + $0x24] sm:$0xf]  ;;  %v1183_v28 = vld [vmem:[%s2475_s25 + $0x1c] sm:$0xff]  ;;  %v1182_v34 = vld [vmem:[%s2475_s25 + $0x14] sm:$0xff] }
  0x58   : > { %1497 = vst.msk [vmem:[#allocation5] sm:$0x3] %vm1496_vm6, %v2441_v12  ;;  %2209 = vmatpush.msk.msrb.mxu1 %vm921_vm0, %v1184_v26  ;;  %1158 = vmatpush.msrb.mxu0 %v1134_v32  ;;  %vm1030_vm7 = vcmask 162816   ;;  %v1076_v38 = vld [vmem:[%s2465_s17 + $0x10] sm:$0xf]  ;;  %v1075_v39 = vld [vmem:[%s2465_s17 + $0x8] sm:$0xff] }
  0x59   : > { %1498 = vst.msk [vmem:[#allocation5 + $0x8] sm:$0x3] %vm1496_vm6, %v2441_v12  ;;  %1101 = vmatpush.msra.mxu3 %v1079_v24  ;;  %v1263_v40 = vld [vmem:[%s2475_s25 + $0x4c] sm:$0xf]  ;;  %v1291_v42 = vld [vmem:[%s2475_s25 + $0x60] sm:$0xf] }
  0x5a   : > { %1500 = vst.msk [vmem:[#allocation6] sm:$0x3] %vm1496_vm6, %v2440_v3  ;;  %1202 = vmatpush.msrb.mxu1 %v1183_v28  ;;  %v1262_v43 = vld [vmem:[%s2475_s25 + $0x44] sm:$0xff]  ;;  %v1290_v44 = vld [vmem:[%s2475_s25 + $0x58] sm:$0xff]  ;;  %v1289_v48 = vld [vmem:[%s2475_s25 + $0x50] sm:$0xff]  ;;  %vm1032_vm8 = vcmask 158720  }
  0x5b   : > { %1501 = vst.msk [vmem:[#allocation6 + $0x5] sm:$0x3] %vm1496_vm6, %v2440_v3  ;;  %1102 = vmatpush.msra.mxu3 %v1078_v31  ;;  %v1074_v46 = vld [vmem:[%s2465_s17] sm:$0xff]  ;;  %v1037_v51 = vld [vmem:[#allocation3] sm:$0x1]  ;;  %v1234_v24 = vld [vmem:[%s2475_s25 + $0x28] sm:$0xff] }
  0x5c   : > { %v912_v6 = vld [vmem:[#allocation2 + $0x1] sm:$0xff]  ;;  %1203 = vmatpush.msrb.mxu1 %v1182_v34  ;;  %v1235_v23 = vld [vmem:[%s2475_s25 + $0x30] sm:$0xff]  ;;  %v1346_v28 = vld [vmem:[%s3012_s3 + $0x18] sm:$0xff]  ;;  %vm1388_vm9 = vcmask 1041408   ;;  %vm1334_vm10 = vcmask 324608   ;;  %vm1348_vm11 = vcmask 326656  }
  0x5d   : > { %v909_v7 = vld [vmem:[#allocation2] sm:$0xff]  ;;  %2195 = vmatmul.msk.f32.vlgmr.msra.gmra.mxu0 %vm905_vm2, %v912_v6  ;;  %v913_v9 = vld [vmem:[#allocation2 + $0x9] sm:$0xf]  ;;  %2205 = vmatpush.msk.msrb.mxu3 %vm921_vm0, %v1076_v38  ;;  %vm1384_vm12 = vcmask 408576   ;;  %s3017_s2 = sld [smem:[#allocation17_spill]]  ;;  %vm1511_vm13 = vcmask 319488  }
  0x5e   : > { %v980_v8 = vld [vmem:[#allocation2 + $0x2] sm:$0xff]  ;;  %2198 = vmatmul.msk.f32.vlgmr.msra.gmra.mxu1 %vm905_vm2, %v909_v7  ;;  %v981_v11 = vld [vmem:[#allocation2 + $0xa] sm:$0xf]  ;;  %2215 = vmatpush.msk.msra.mxu0 %vm921_vm0, %v1263_v40  ;;  %v2315_v34 = vld [vmem:[%s2470_s21] ss:$0 sm:$0xff]  ;;  %s3018_s16 = sld [smem:[#allocation19_spill]] }
  0x5f   : > { %2201 = vmatmul.msk.f32.vlgmr.msra.gmra.mxu2 %vm905_vm2, %v980_v8  ;;  %v910_v10 = vld [vmem:[#allocation2 + $0x8] sm:$0xf]  ;;  %2217 = vmatpush.msk.msra.mxu1 %vm921_vm0, %v1291_v42  ;;  %v1261_v47 = vld [vmem:[%s2475_s25 + $0x3c] sm:$0xff]  ;;  %s3019_s22 = sld [smem:[#allocation21_spill]]  ;;  %vm1786_vm14 = vcmask 649216   ;;  %vm1805_vm15 = vcmask 654336  }
  0x60   : > { %1127 = vmatpush.msrb.mxu3 %v1075_v39  ;;  %1281 = vmatpush.msra.mxu0 %v1262_v43  ;;  %v1347_v27 = vld [vmem:[%s3012_s3 + $0x20] sm:$0xff]  ;;  %s3022_s5 = sld [smem:[#allocation23_spill]]  ;;  %s2367_s13 = scalar_lea.hbm %s2595_s4, 2 }
  0x61   : > { %1312 = vmatpush.msra.mxu1 %v1290_v44  ;;  %1363 = vmatpush.msra.mxu2 %v1347_v27  ;;  %v2316_v39 = vld [vmem:[%s2470_s21 + $0x1] ss:$0 sm:$0xff]  ;;  %v1419_v27 = vld [vmem:[%s2505_s24 + $0x10] sm:$0xff] }
  0x62   : > { %1128 = vmatpush.msrb.mxu3 %v1074_v46  ;;  %1282 = vmatpush.msra.mxu0 %v1261_v47  ;;  %v2319_v47 = vld [vmem:[%s2480_s29] ss:$0 sm:$0xff] }
  0x63   : > { %1313 = vmatpush.msra.mxu1 %v1289_v48  ;;  %1364 = vmatpush.msra.mxu2 %v1346_v28  ;;  %v1452_v28 = vld [vmem:[%s3011_s6 + $0x10] sm:$0xff] }
  0x65   : > { %2196 = vmatmul.msk.f32.gmra.mxu0 %vm905_vm2, %v913_v9 }
  0x66   : > { %2199 = vmatmul.msk.f32.gmra.mxu1 %vm905_vm2, %v910_v10 }
  0x67   : > { %2202 = vmatmul.msk.f32.gmra.mxu2 %vm905_vm2, %v981_v11 }
  0xda   : > { %v942_v16 = vpop.f32.mrf.mxu0 }
  0xdb   : > { %v974_v17 = vpop.f32.mrf.mxu1 }
  0xdc   : > { %v975_v18 = vadd.f32 %v974_v17, %v942_v16 }
  0xe2   : > { %v1009_v21 = vpop.f32.mrf.mxu2  ;;  %v945_v29 = vpop.f32.mrf.mxu0 }
  0xe3   : > { %v1015_v25 = vadd.f32 %v1009_v21, %v975_v18  ;;  %v977_v30 = vpop.f32.mrf.mxu1 }
  0xe4   : > { %v978_v36 = vadd.f32 %v977_v30, %v945_v29  ;;  %v1345_v29 = vld [vmem:[%s3012_s3 + $0x10] sm:$0xff]  ;;  %v1344_v30 = vld [vmem:[%s3012_s3 + $0x8] sm:$0xff] }
  0xe5   : > { %v1019_v33 = vmul.f32 %v2313_v19, %v1015_v25  ;;  %1365 = vmatpush.msra.mxu2 %v1345_v29  ;;  %v1418_v29 = vld [vmem:[%s2505_s24 + $0x8] sm:$0xff] }
  0xe7   : > { %v1023_v35 = vadd.f32 %v2314_v20, %v1019_v33  ;;  %1366 = vmatpush.msra.mxu2 %v1344_v30  ;;  %v1451_v30 = vld [vmem:[%s3011_s6 + $0x8] sm:$0xff] }
  0xe9   : > { %v1025_v37 = vmax.f32 %v1023_v35, 0.0  ;;  %v1343_v35 = vld [vmem:[%s3012_s3] sm:$0xff]  ;;  %s3021_s3 = sld [smem:[#allocation20_spill]] }
  0xea   : > { %v1012_v41 = vpop.f32.mrf.mxu2  ;;  %1367 = vmatpush.msra.mxu2 %v1343_v35  ;;  %v1414_v35 = vld [vmem:[%s2500_s19 + $0x1] sm:$0x1] }
  0xeb   : > { %1031 = vst.msk [vmem:[#allocation3 + $0x1] sm:$0xff] %vm1030_vm7, %v1025_v37  ;;  %v1016_v45 = vadd.f32 %v1012_v41, %v978_v36 }
  0xed   : > { %v1020_v49 = vmul.f32 %v2313_v19, %v1016_v45 }
  0xef   : > { %v1024_v50 = vadd.f32 %v2314_v20, %v1020_v49  ;;  %v1236_v20 = vld [vmem:[%s2475_s25 + $0x38] sm:$0xf]  ;;  %v1383_v49 = vld [vmem:[%s2495_s14 + $0x30] sm:$0x3] }
  0xf1   : > { %v1026_v52 = vmax.f32 %v1024_v50, 0.0  ;;  %v1382_v50 = vld [vmem:[%s2495_s14 + $0x28] sm:$0xff] }
  0xf2   : > { %v1038_v53 = vld [vmem:[#allocation3 + $0x1] sm:$0x1]  ;;  %v1043_v54 = vld [vmem:[#allocation3 + $0x2] sm:$0x1]  ;;  %v1044_v55 = vld [vmem:[#allocation3 + $0x3] sm:$0x1] }
  0xf3   : > { %v1049_v56 = vld [vmem:[#allocation3 + $0x4] sm:$0x1]  ;;  %v1050_v57 = vld [vmem:[#allocation3 + $0x5] sm:$0x1]  ;;  %v1055_v58 = vld [vmem:[#allocation3 + $0x6] sm:$0x1]  ;;  %v1039_v59 = vmax.f32 %v1037_v51, %v1038_v53  ;;  %v1045_v60 = vmax.f32 %v1043_v54, %v1044_v55 }
  0xf4   : > { %v1056_v61 = vld [vmem:[#allocation3 + $0x7] sm:$0x1]  ;;  %1033 = vst.msk [vmem:[#allocation3 + $0x9] sm:$0xf] %vm1032_vm8, %v1026_v52  ;;  %v1040_v62 = vld [vmem:[#allocation3 + $0x2] sm:$0x1]  ;;  %v1051_v63 = vmax.f32 %v1049_v56, %v1050_v57 }
  0xf5   : > { %v1041_v0 = vmax.f32 %v1039_v59, %v1040_v62  ;;  %v1046_v1 = vld [vmem:[#allocation3 + $0x4] sm:$0x1]  ;;  %v1052_v2 = vld [vmem:[#allocation3 + $0x6] sm:$0x1]  ;;  %v1057_v3 = vmax.f32 %v1055_v58, %v1056_v61  ;;  %v1058_v6 = vld [vmem:[#allocation3 + $0x8] sm:$0x1] }
  0xf6   : > { %v1047_v4 = vmax.f32 %v1045_v60, %v1046_v1  ;;  %v1053_v5 = vmax.f32 %v1051_v63, %v1052_v2  ;;  %v1061_v8 = vld [vmem:[#allocation3 + $0x8] sm:$0x1]  ;;  %v2317_v52 = vld [vmem:[%s2470_s21 + $0x2] ss:$0 sm:$0xff]  ;;  %v2320_v54 = vld [vmem:[%s2480_s29 + $0x1] ss:$0 sm:$0xff] }
  0xf7   : > { %1042 = vst.msk [vmem:[#allocation4 + $0x2] sm:$0x1] %vm1027_vm4, %v1041_v0  ;;  %v1059_v7 = vmax.f32 %v1057_v3, %v1058_v6  ;;  %v1381_v55 = vld [vmem:[%s2495_s14 + $0x20] sm:$0xff] }
  0xf8   : > { %1048 = vst.msk [vmem:[#allocation4 + $0x3] sm:$0x1] %vm1027_vm4, %v1047_v4  ;;  %v2318_v58 = vld [vmem:[%s2470_s21 + $0x3] ss:$0 sm:$0xff]  ;;  %v2321_v60 = vld [vmem:[%s2480_s29 + $0x2] ss:$0 sm:$0xff] }
  0xf9   : > { %1054 = vst.msk [vmem:[#allocation4 + $0x4] sm:$0x1] %vm1027_vm4, %v1053_v5  ;;  %v2322_v62 = vld [vmem:[%s2480_s29 + $0x3] ss:$0 sm:$0xff] }
  0xfa   : > { %1060 = vst.msk [vmem:[#allocation4 + $0x5] sm:$0x1] %vm1027_vm4, %v1059_v7 }
  0xfb   : > { %v1062_v9 = vld [vmem:[#allocation3 + $0x9] sm:$0x1]  ;;  %v1067_v10 = vld [vmem:[#allocation3 + $0xa] sm:$0x1]  ;;  %v1068_v12 = vld [vmem:[#allocation3 + $0xb] sm:$0x1] }
  0xfc   : > { %v1063_v11 = vmax.f32 %v1061_v8, %v1062_v9  ;;  %v1064_v13 = vld [vmem:[#allocation3 + $0xa] sm:$0x1]  ;;  %v1069_v14 = vmax.f32 %v1067_v10, %v1068_v12  ;;  %v1070_v16 = vld [vmem:[#allocation3 + $0xc] sm:$0x1] }
  0xfe   : > { %v1065_v15 = vmax.f32 %v1063_v11, %v1064_v13  ;;  %v1071_v17 = vmax.f32 %v1069_v14, %v1070_v16  ;;  %v1380_v13 = vld [vmem:[%s2495_s14 + $0x18] sm:$0xff]  ;;  %v1379_v14 = vld [vmem:[%s2495_s14 + $0x10] sm:$0xff]  ;;  %v1377_v16 = vld [vmem:[%s2495_s14] sm:$0xff] }
 0x100   : > { %1066 = vst.msk [vmem:[#allocation4 + $0x6] sm:$0x1] %vm1027_vm4, %v1065_v15  ;;  %v1378_v15 = vld [vmem:[%s2495_s14 + $0x8] sm:$0xff] }
 0x101   : > { %v1178_v18 = vld [vmem:[#allocation4] sm:$0x3f]  ;;  %1072 = vst.msk [vmem:[#allocation4 + $0x7] sm:$0x1] %vm1027_vm4, %v1071_v17 }
 0x102   : > { %2212 = vmatmul.msk.f32.vlgmr.msrb.gmra.mxu2 %vm1030_vm7, %v1178_v18  ;;  %v1421_v17 = vld [vmem:[%s2505_s24 + $0x20] sm:$0xff] }
 0x103   : > { %v1454_v18 = vld [vmem:[%s3011_s6 + $0x20] sm:$0xff] }
 0x107   : > { %v1073_v19 = vld [vmem:[#allocation4 + $0x1] sm:$0x3f] }
 0x108   : > { %v1077_v21 = vld [vmem:[#allocation4 + $0x2] sm:$0x3f]  ;;  %2210 = vmatmul.msk.f32.vlgmr.msrb.gmra.mxu1 %vm1030_vm7, %v1073_v19 }
 0x109   : > { %v1133_v22 = vld [vmem:[#allocation4 + $0x3] sm:$0x3f]  ;;  %2204 = vmatmul.msk.f32.vlgmr.msra.gmra.mxu3 %vm1030_vm7, %v1077_v21 }
 0x10a   : > { %2208 = vmatmul.msk.f32.vlgmr.msrb.gmra.mxu0 %vm1030_vm7, %v1133_v22  ;;  %2213 = vmatpush.msk.msra.mxu3 %vm921_vm0, %v1236_v20  ;;  %v1288_v25 = vld [vmem:[#allocation4 + $0x4] sm:$0x3f]  ;;  %vm2064_vm0 = vcmask 32768  }
 0x10b   : > { %1436 = vmatpush.msrb.mxu0 %v1421_v17  ;;  %v1693_v17 = vld [vmem:[%s3018_s16 + $0x70] sm:$0xff] }
 0x10c   : > { %1254 = vmatpush.msra.mxu3 %v1235_v23 }
 0x10e   : > { %1255 = vmatpush.msra.mxu3 %v1234_v24 }
 0x110   : > { %2218 = vmatmul.msk.f32.vlgmr.msra.gmra.mxu1 %vm1030_vm7, %v1288_v25  ;;  %v1420_v25 = vld [vmem:[%s2505_s24 + $0x18] sm:$0xff] }
 0x111   : > { %2206 = vmatmul.msk.f32.vlgmr.msrb.gmra.mxu3 %vm1030_vm7, %v1073_v19  ;;  %v1372_v19 = vld [vmem:[%s3010_s8] sm:$0x1]  ;;  %1437 = vmatpush.msrb.mxu0 %v1420_v25 }
 0x112   : > { %2216 = vmatmul.msk.f32.vlgmr.msra.gmra.mxu0 %vm1030_vm7, %v1133_v22  ;;  %2220 = vmatpush.msk.msrb.mxu3 %vm1388_vm9, %v1383_v49 }
 0x113   : > { %1438 = vmatpush.msrb.mxu0 %v1419_v27 }
 0x114   : > { %1402 = vmatpush.msrb.mxu3 %v1382_v50 }
 0x115   : > { %1439 = vmatpush.msrb.mxu0 %v1418_v29  ;;  %v1692_v29 = vld [vmem:[%s3018_s16 + $0x68] sm:$0xff] }
 0x116   : > { %1403 = vmatpush.msrb.mxu3 %v1381_v55  ;;  %v1645_v55 = vld [vmem:[%s3018_s16 + $0x48] sm:$0xff] }
 0x118   : > { %1404 = vmatpush.msrb.mxu3 %v1380_v13  ;;  %v1534_v13 = vld [vmem:[%s3017_s2] sm:$0xff] }
 0x119   : > { %2214 = vmatmul.msk.f32.vlgmr.msra.gmra.mxu3 %vm1030_vm7, %v1077_v21  ;;  %v1374_v21 = vld [vmem:[%s3010_s8 + $0x1] sm:$0x1] }
 0x11a   : > { %1405 = vmatpush.msrb.mxu3 %v1379_v14  ;;  %v1592_v14 = vld [vmem:[%s3017_s2 + $0x50] sm:$0xff] }
 0x11c   : > { %1406 = vmatpush.msrb.mxu3 %v1378_v15  ;;  %v1641_v15 = vld [vmem:[%s3018_s16 + $0x28] sm:$0xff] }
 0x11e   : > { %1407 = vmatpush.msrb.mxu3 %v1377_v16  ;;  %v1640_v16 = vld [vmem:[%s3018_s16 + $0x20] sm:$0xff] }
 0x120   : > { %1466 = vmatpush.msra.mxu3 %v1454_v18  ;;  %v1719_v18 = vld [vmem:[%s3018_s16 + $0x98] sm:$0xff] }
 0x185   : > { %v1205_v36 = vpop.f32.mrf.mxu1  ;;  %v1231_v40 = vpop.f32.mrf.mxu2 }
 0x186   : > { %v1232_v41 = vadd.f32 %v1231_v40, %v1205_v36  ;;  %v1445_v40 = vld [vmem:[%s2510_s30] sm:$0x1] }
 0x187   : > { %v1160_v31 = vpop.f32.mrf.mxu0 }
 0x18c   : > { %v1104_v26 = vpop.f32.mrf.mxu3 }
 0x18d   : > { %v1315_v48 = vpop.f32.mrf.mxu1 }
 0x18f   : > { %v1284_v45 = vpop.f32.mrf.mxu0 }
 0x194   : > { %v1130_v32 = vpop.f32.mrf.mxu3 }
 0x195   : > { %v1131_v33 = vadd.f32 %v1130_v32, %v1104_v26  ;;  %v1453_v26 = vld [vmem:[%s3011_s6 + $0x18] sm:$0xff]  ;;  %v1450_v32 = vld [vmem:[%s3011_s6] sm:$0xff]  ;;  %s3025_s6 = sld [smem:[#allocation22_spill]] }
 0x196   : > { %1467 = vmatpush.msra.mxu3 %v1453_v26 }
 0x197   : > { %v1163_v37 = vadd.f32 %v1160_v31, %v1131_v33  ;;  %v1417_v31 = vld [vmem:[%s2505_s24] sm:$0xff] }
 0x198   : > { %1468 = vmatpush.msra.mxu3 %v1452_v28  ;;  %1440 = vmatpush.msrb.mxu0 %v1417_v31  ;;  %v1412_v33 = vld [vmem:[%s2500_s19] sm:$0x1]  ;;  %v1639_v28 = vld [vmem:[%s3018_s16 + $0x18] sm:$0xff] }
 0x199   : > { %v1166_v38 = vmul.f32 %v2315_v34, %v1163_v37 }
 0x19a   : > { %1469 = vmatpush.msra.mxu3 %v1451_v30  ;;  %v1718_v30 = vld [vmem:[%s3018_s16 + $0x90] sm:$0xff] }
 0x19b   : > { %v1169_v43 = vadd.f32 %v2316_v39, %v1166_v38 }
 0x19c   : > { %v1257_v42 = vpop.f32.mrf.mxu3  ;;  %1470 = vmatpush.msra.mxu3 %v1450_v32 }
 0x19d   : > { %v1260_v44 = vadd.f32 %v1257_v42, %v1232_v41  ;;  %v1170_v51 = vmax.f32 %v1169_v43, 0.0  ;;  %v1447_v42 = vld [vmem:[%s2510_s30 + $0x1] sm:$0x1]  ;;  %v1475_v43 = vld [vmem:[%s3016_s23] sm:$0x1] }
 0x19f   : > { %v1287_v46 = vadd.f32 %v1284_v45, %v1260_v44  ;;  %v1173_v57 = vmul.f32 %v2317_v52, %v1170_v51  ;;  %v1477_v45 = vld [vmem:[%s3016_s23 + $0x1] sm:$0x1]  ;;  %v1544_v51 = vld [vmem:[%s3017_s2 + $0x48] sm:$0xff] }
 0x1a0   : > { %v1538_v52 = vld [vmem:[%s3017_s2 + $0x20] sm:$0xff]  ;;  %1559 = vmatpush.msrb.mxu2 %v1544_v51 }
 0x1a1   : > { %v1318_v53 = vadd.f32 %v1315_v48, %v1287_v46  ;;  %v2732_v63 = vadd.f32 %v2318_v58, %v1173_v57  ;;  %1582 = vmatpush.msra.mxu0 %v1538_v52  ;;  %v1537_v57 = vld [vmem:[%s3017_s2 + $0x18] sm:$0xff]  ;;  %v1595_v58 = vld [vmem:[%s3017_s2 + $0x68] sm:$0xff] }
 0x1a3   : > { %v1321_v56 = vmul.f32 %v2319_v47, %v1318_v53  ;;  %v1177_v2 = vmax.f32 %v2732_v63, 0.0  ;;  %v1596_v53 = vld [vmem:[%s3017_s2 + $0x70] sm:$0xff]  ;;  %1583 = vmatpush.msra.mxu0 %v1537_v57  ;;  %v1637_v63 = vld [vmem:[%s3018_s16 + $0x8] sm:$0xff] }
 0x1a4   : > { %1611 = vmatpush.msrb.mxu1 %v1596_v53 }
 0x1a5   : > { %v1324_v59 = vadd.f32 %v2320_v54, %v1321_v56  ;;  %v1543_v56 = vld [vmem:[%s3017_s2 + $0x40] sm:$0xff] }
 0x1a6   : > { %1560 = vmatpush.msrb.mxu2 %v1543_v56  ;;  %1612 = vmatpush.msrb.mxu1 %v1595_v58 }
 0x1a7   : > { %v1325_v61 = vmax.f32 %v1324_v59, 0.0  ;;  %v1644_v59 = vld [vmem:[%s3018_s16 + $0x40] sm:$0xff] }
 0x1a9   : > { %v1328_v0 = vmul.f32 %v2321_v60, %v1325_v61  ;;  %v1542_v60 = vld [vmem:[%s3017_s2 + $0x38] sm:$0xff] }
 0x1aa   : > { %1561 = vmatpush.msrb.mxu2 %v1542_v60 }
 0x1ab   : > { %v2734_v1 = vadd.f32 %v2322_v62, %v1328_v0  ;;  %v1536_v0 = vld [vmem:[%s3017_s2 + $0x10] sm:$0xff] }
 0x1ac   : > { %1584 = vmatpush.msra.mxu0 %v1536_v0 }
 0x1ad   : > { %v1332_v3 = vmax.f32 %v2734_v1, 0.0  ;;  %v1690_v1 = vld [vmem:[%s3018_s16 + $0x58] sm:$0xff] }
 0x1af   : > { %v1333_v4 = vadd.f32 %v1332_v3, %v1177_v2 }
 0x1b1   : > { %v1335_v5 = vsel %vm1334_vm10, %v1333_v4, 0.0  ;;  %v1594_v4 = vld [vmem:[%s3017_s2 + $0x60] sm:$0xff] }
 0x1b2   : > { %v1336_v6 = vrot.slane %v1335_v5, 4  ;;  %1613 = vmatpush.msrb.mxu1 %v1594_v4  ;;  %v1530_v4 = vld [vmem:[#allocation5 + $0x8] sm:$0x1] }
 0x1b4   : > { %v1337_v7 = vadd.f32 %v1336_v6, %v1335_v5  ;;  %v1643_v5 = vld [vmem:[%s3018_s16 + $0x38] sm:$0xff]  ;;  %v1541_v6 = vld [vmem:[%s3017_s2 + $0x30] sm:$0xff] }
 0x1b5   : > { %1562 = vmatpush.msrb.mxu2 %v1541_v6 }
 0x1b6   : > { %v1338_v8 = vrot.slane %v1337_v7, 2 }
 0x1b8   : > { %v1339_v9 = vadd.f32 %v1338_v8, %v1337_v7  ;;  %v1535_v7 = vld [vmem:[%s3017_s2 + $0x8] sm:$0xff] }
 0x1b9   : > { %1585 = vmatpush.msra.mxu0 %v1535_v7 }
 0x1ba   : > { %v1340_v10 = vrot.slane %v1339_v9, 1 }
 0x1bb   : > { %1586 = vmatpush.msra.mxu0 %v1534_v13 }
 0x1bc   : > { %v1341_v11 = vadd.f32 %v1340_v10, %v1339_v9  ;;  %v1593_v10 = vld [vmem:[%s3017_s2 + $0x58] sm:$0xff] }
 0x1bd   : > { %1614 = vmatpush.msrb.mxu1 %v1593_v10 }
 0x1be   : > { %v1342_v12 = vmul.f32 0.16666667, %v1341_v11  ;;  %v1642_v11 = vld [vmem:[%s3018_s16 + $0x30] sm:$0xff] }
 0x1bf   : > { %1615 = vmatpush.msrb.mxu1 %v1592_v14 }
 0x1c0   : > { %2219 = vmatmul.msk.f32.vlgmr.msra.gmra.mxu2 %vm1348_vm11, %v1342_v12  ;;  %v1540_v12 = vld [vmem:[%s3017_s2 + $0x28] sm:$0xff]  ;;  %s3020_s2 = sld [smem:[#allocation18_spill]] }
 0x1c1   : > { %1563 = vmatpush.msrb.mxu2 %v1540_v12  ;;  %1731 = vmatpush.msra.mxu1 %v1719_v18 }
 0x1c3   : > { %1680 = vmatpush.msra.mxu2 %v1640_v16  ;;  %1732 = vmatpush.msra.mxu1 %v1718_v30  ;;  %v1803_v16 = vld [vmem:[%s3019_s22 + $0x40] sm:$0xff] }
 0x1c5   : > { %1681 = vmatpush.msra.mxu2 %v1639_v28  ;;  %v1798_v28 = vld [vmem:[%s3019_s22 + $0x18] sm:$0xff] }
 0x243   : > { %v1369_v20 = vpop.f32.mrf.mxu2 }
 0x244   : > { %v1373_v22 = vmul.f32 %v1372_v19, %v1369_v20  ;;  %v1746_v19 = vld [vmem:[%s3018_s16 + $0xc0] sm:$0xff] }
 0x246   : > { %v1375_v23 = vadd.f32 %v1374_v21, %v1373_v22 }
 0x248   : > { %v1376_v24 = vmax.f32 %v1375_v23, 0.0 }
 0x24a   : > { %2221 = vmatmul.msk.f32.vlgmr.msrb.gmra.mxu3 %vm1384_vm12, %v1376_v24 }
 0x24b   : > { %1657 = vmatpush.msrb.mxu3 %v1645_v55 }
 0x24d   : > { %1658 = vmatpush.msrb.mxu3 %v1644_v59 }
 0x24f   : > { %1659 = vmatpush.msrb.mxu3 %v1643_v5 }
 0x251   : > { %1660 = vmatpush.msrb.mxu3 %v1642_v11 }
 0x253   : > { %1661 = vmatpush.msrb.mxu3 %v1641_v15  ;;  %v1804_v15 = vld [vmem:[%s3019_s22 + $0x48] sm:$0xff] }
 0x2cd   : > { %v1409_v34 = vpop.f32.mrf.mxu3 }
 0x2ce   : > { %v1413_v36 = vmul.f32 %v1412_v33, %v1409_v34  ;;  %v1745_v33 = vld [vmem:[%s3018_s16 + $0xb8] sm:$0xff]  ;;  %v1638_v34 = vld [vmem:[%s3018_s16 + $0x10] sm:$0xff] }
 0x2cf   : > { %1682 = vmatpush.msra.mxu2 %v1638_v34 }
 0x2d0   : > { %v1415_v37 = vadd.f32 %v1414_v35, %v1413_v36  ;;  %v1691_v35 = vld [vmem:[%s3018_s16 + $0x60] sm:$0xff]  ;;  %v1717_v36 = vld [vmem:[%s3018_s16 + $0x88] sm:$0xff] }
 0x2d1   : > { %1733 = vmatpush.msra.mxu1 %v1717_v36  ;;  %1683 = vmatpush.msra.mxu2 %v1637_v63  ;;  %v1795_v36 = vld [vmem:[%s3019_s22] sm:$0xff] }
 0x2d2   : > { %v1416_v38 = vmax.f32 %v1415_v37, 0.0  ;;  %v1744_v37 = vld [vmem:[%s3018_s16 + $0xb0] sm:$0xff] }
 0x2d4   : > { %2222 = vmatmul.msk.f32.vlgmr.msrb.gmra.mxu0 %vm1348_vm11, %v1416_v38  ;;  %2223 = vmatmul.msk.f32.vlgmr.msra.gmra.mxu3 %vm1348_vm11, %v1416_v38  ;;  %v1743_v38 = vld [vmem:[%s3018_s16 + $0xa8] sm:$0xff] }
 0x2d5   : > { %1705 = vmatpush.msrb.mxu0 %v1693_v17  ;;  %1761 = vmatpush.msra.mxu3 %v1746_v19  ;;  %v1802_v17 = vld [vmem:[%s3019_s22 + $0x38] sm:$0xff] }
 0x2d7   : > { %1706 = vmatpush.msrb.mxu0 %v1692_v29  ;;  %1762 = vmatpush.msra.mxu3 %v1745_v33  ;;  %v1797_v29 = vld [vmem:[%s3019_s22 + $0x10] sm:$0xff]  ;;  %v1796_v33 = vld [vmem:[%s3019_s22 + $0x8] sm:$0xff] }
 0x2d9   : > { %1707 = vmatpush.msrb.mxu0 %v1691_v35  ;;  %1763 = vmatpush.msra.mxu3 %v1744_v37 }
 0x2db   : > { %1708 = vmatpush.msrb.mxu0 %v1690_v1  ;;  %1764 = vmatpush.msra.mxu3 %v1743_v38 }
 0x351   : > { %v1442_v39 = vpop.f32.mrf.mxu0 }
 0x352   : > { %v1446_v41 = vmul.f32 %v1445_v40, %v1442_v39  ;;  %v1636_v39 = vld [vmem:[%s3018_s16] sm:$0xff]  ;;  %v1689_v40 = vld [vmem:[%s3018_s16 + $0x50] sm:$0xff] }
 0x353   : > { %1684 = vmatpush.msra.mxu2 %v1636_v39  ;;  %1709 = vmatpush.msrb.mxu0 %v1689_v40  ;;  %v1840_v39 = vld [vmem:[%s3022_s5 + $0x30] sm:$0x3]  ;;  %v1839_v40 = vld [vmem:[%s3022_s5 + $0x28] sm:$0xff] }
 0x354   : > { %v1448_v46 = vadd.f32 %v1447_v42, %v1446_v41  ;;  %v1715_v41 = vld [vmem:[%s3018_s16 + $0x78] sm:$0xff]  ;;  %v1742_v42 = vld [vmem:[%s3018_s16 + $0xa0] sm:$0xff] }
 0x355   : > { %1765 = vmatpush.msra.mxu3 %v1742_v42  ;;  %v2325_v42 = vld [vmem:[%s3020_s2 + $0x2] ss:$0 sm:$0xff] }
 0x356   : > { %v1449_v49 = vmax.f32 %v1448_v46, 0.0 }
 0x357   : > { %v1472_v44 = vpop.f32.mrf.mxu3 }
 0x358   : > { %v1476_v47 = vmul.f32 %v1475_v43, %v1472_v44  ;;  %v1502_v43 = vld [vmem:[#allocation5] sm:$0x1]  ;;  %v1503_v44 = vld [vmem:[#allocation5 + $0x1] sm:$0x1] }
 0x35a   : > { %v1478_v48 = vadd.f32 %v1477_v45, %v1476_v47  ;;  %v1504_v45 = vmax.f32 %v1502_v43, %v1503_v44  ;;  %v2328_v44 = vld [vmem:[%s3021_s3 + $0x1] ss:$0 sm:$0xff] }
 0x35c   : > { %v1479_v50 = vmax.f32 %v1478_v48, 0.0 }
 0x35e   : > { %v1480_v54 = vmax.f32 %v1449_v49, %v1479_v50 }
 0x360   : > { %v1481_v61 = vsub.f32 %v1449_v49, %v1480_v54  ;;  %v1484_v62 = vsub.f32 %v1479_v50, %v1480_v54 }
 0x362   : > { %v1482_v8 = vmul.f32 1.442695, %v1481_v61  ;;  %v1485_v9 = vmul.f32 1.442695, %v1484_v62 }
 0x364   : > { %2331 = vpow2.f32 %v1482_v8 }
 0x365   : > { %2333 = vpow2.f32 %v1485_v9 }
 0x36a   : > { %v2332_v20 = vpop.eup %2331 }
 0x36b   : > { %v2334_v21 = vpop.eup %2333 }
 0x36c   : > { %v1487_v22 = vadd.f32 %v2334_v21, %v2332_v20 }
 0x36e   : > { %2335 = vrcp.f32 %v1487_v22 }
 0x374   : > { %v2336_v23 = vpop.eup %2335 }
 0x375   : > { %v1489_v24 = vmul.f32 %v2336_v23, %v2332_v20  ;;  %v1492_v25 = vmul.f32 %v2336_v23, %v2334_v21  ;;  %v1801_v20 = vld [vmem:[%s3019_s22 + $0x30] sm:$0xff]  ;;  %v1800_v23 = vld [vmem:[%s3019_s22 + $0x28] sm:$0xff] }
 0x377   : > { %v1490_v26 = vperm.slane %v1489_v24, 0  ;;  %v1493_v27 = vperm.slane %v1492_v25, 0  ;;  %v1799_v24 = vld [vmem:[%s3019_s22 + $0x20] sm:$0xff] }
 0x379   : > { %v1491_v31 = vmul.f32 %v1490_v26, %v1177_v2  ;;  %v1494_v32 = vmul.f32 %v1493_v27, %v1332_v3  ;;  %v1716_v3 = vld [vmem:[%s3018_s16 + $0x80] sm:$0xff] }
 0x37a   : > { %1734 = vmatpush.msra.mxu1 %v1716_v3  ;;  %v2323_v26 = vld [vmem:[%s3020_s2] ss:$0 sm:$0xff] }
 0x37b   : > { %v1495_v2 = vadd.f32 %v1494_v32, %v1491_v31  ;;  %v2324_v31 = vld [vmem:[%s3020_s2 + $0x1] ss:$0 sm:$0xff]  ;;  %v2327_v3 = vld [vmem:[%s3021_s3] ss:$0 sm:$0xff] }
 0x37c   : > { %1735 = vmatpush.msra.mxu1 %v1715_v41 }
 0x37d   : > { %1499 = vst.msk [vmem:[#allocation5 + $0x2] sm:$0x3f] %vm1334_vm10, %v1495_v2 }
 0x384   : > { %v1505_v46 = vld [vmem:[#allocation5 + $0x2] sm:$0x1]  ;;  %v1514_v49 = vld [vmem:[#allocation5 + $0x3] sm:$0x1]  ;;  %v1523_v52 = vld [vmem:[#allocation5 + $0x4] sm:$0x1] }
 0x385   : > { %v1506_v47 = vmax.f32 %v1504_v45, %v1505_v46  ;;  %v1513_v48 = vld [vmem:[#allocation5 + $0x2] sm:$0x1]  ;;  %v1507_v50 = vld [vmem:[#allocation5 + $0x3] sm:$0x1]  ;;  %v1516_v54 = vld [vmem:[#allocation5 + $0x4] sm:$0x1] }
 0x386   : > { %v1515_v51 = vmax.f32 %v1513_v48, %v1514_v49  ;;  %v1524_v55 = vld [vmem:[#allocation5 + $0x5] sm:$0x1]  ;;  %v1509_v56 = vld [vmem:[#allocation5 + $0x4] sm:$0x1]  ;;  %v1526_v61 = vld [vmem:[#allocation5 + $0x6] sm:$0x1] }
 0x387   : > { %v1508_v53 = vmax.f32 %v1506_v47, %v1507_v50  ;;  %v1525_v58 = vmax.f32 %v1523_v52, %v1524_v55  ;;  %v1518_v60 = vld [vmem:[#allocation5 + $0x5] sm:$0x1]  ;;  %v1520_v5 = vld [vmem:[#allocation5 + $0x6] sm:$0x1]  ;;  %v1528_v6 = vld [vmem:[#allocation5 + $0x7] sm:$0x1] }
 0x388   : > { %v1517_v57 = vmax.f32 %v1515_v51, %v1516_v54  ;;  %v1838_v45 = vld [vmem:[%s3022_s5 + $0x20] sm:$0xff] }
 0x389   : > { %v1510_v59 = vmax.f32 %v1508_v53, %v1509_v56  ;;  %v1527_v0 = vmax.f32 %v1525_v58, %v1526_v61  ;;  %v2326_v48 = vld [vmem:[%s3020_s2 + $0x3] ss:$0 sm:$0xff]  ;;  %v2329_v50 = vld [vmem:[%s3021_s3 + $0x2] ss:$0 sm:$0xff]  ;;  %s3023_s2 = sld [smem:[#allocation25_spill]] }
 0x38a   : > { %v1519_v62 = vmax.f32 %v1517_v57, %v1518_v60  ;;  %v2330_v52 = vld [vmem:[%s3021_s3 + $0x3] ss:$0 sm:$0xff]  ;;  %s3024_s3 = sld [smem:[#allocation27_spill]] }
 0x38b   : > { %1512 = vst.msk [vmem:[#allocation6 + $0x2] sm:$0x1] %vm1511_vm13, %v1510_v59  ;;  %v1529_v8 = vmax.f32 %v1527_v0, %v1528_v6 }
 0x38c   : > { %v1521_v7 = vmax.f32 %v1519_v62, %v1520_v5 }
 0x38d   : > { %v1531_v9 = vmax.f32 %v1529_v8, %v1530_v4  ;;  %v1836_v8 = vld [vmem:[%s3022_s5 + $0x10] sm:$0xff] }
 0x38e   : > { %1522 = vst.msk [vmem:[#allocation6 + $0x3] sm:$0x1] %vm1511_vm13, %v1521_v7  ;;  %v1837_v7 = vld [vmem:[%s3022_s5 + $0x18] sm:$0xff] }
 0x38f   : > { %1532 = vst.msk [vmem:[#allocation6 + $0x4] sm:$0x1] %vm1511_vm13, %v1531_v9  ;;  %v1835_v9 = vld [vmem:[%s3022_s5 + $0x8] sm:$0xff] }
 0x392   : > { %v1635_v14 = vld [vmem:[#allocation6] sm:$0x7] }
 0x395   : > { %v1533_v10 = vld [vmem:[#allocation6 + $0x1] sm:$0x7] }
 0x396   : > { %2225 = vmatmul.msk.f32.vlgmr.msra.gmra.mxu0 %vm1348_vm11, %v1533_v10  ;;  %2227 = vmatmul.msk.f32.vlgmr.msrb.gmra.mxu3 %vm1348_vm11, %v1533_v10  ;;  %v1539_v11 = vld [vmem:[#allocation6 + $0x2] sm:$0x7] }
 0x397   : > { %v1591_v12 = vld [vmem:[#allocation6 + $0x3] sm:$0x7]  ;;  %2224 = vmatmul.msk.f32.vlgmr.msrb.gmra.mxu2 %vm1348_vm11, %v1539_v11  ;;  %2233 = vmatpush.msk.msra.mxu0 %vm1388_vm9, %v1840_v39  ;;  %v1971_v39 = vld [vmem:[%s2585_s20 + $0x48] sm:$0xff] }
 0x398   : > { %2226 = vmatmul.msk.f32.vlgmr.msrb.gmra.mxu1 %vm1348_vm11, %v1591_v12  ;;  %v1741_v13 = vld [vmem:[#allocation6 + $0x4] sm:$0x7]  ;;  %1815 = vmatpush.msrb.mxu2 %v1804_v15  ;;  %v1879_v15 = vld [vmem:[%s3023_s2 + $0x38] sm:$0xff] }
 0x399   : > { %1857 = vmatpush.msra.mxu0 %v1839_v40  ;;  %v1834_v10 = vld [vmem:[%s3022_s5] sm:$0xff]  ;;  %s3026_s5 = sld [smem:[#allocation24_spill]] }
 0x39a   : > { %1816 = vmatpush.msrb.mxu2 %v1803_v16  ;;  %v1917_v16 = vld [vmem:[%s3024_s3 + $0x38] sm:$0xff]  ;;  %v1970_v40 = vld [vmem:[%s2585_s20 + $0x40] sm:$0xff] }
 0x39b   : > { %1858 = vmatpush.msra.mxu0 %v1838_v45  ;;  %v2038_v45 = vld [vmem:[%s2585_s20 + $0xe0] sm:$0xff] }
 0x39c   : > { %1817 = vmatpush.msrb.mxu2 %v1802_v17  ;;  %v1878_v17 = vld [vmem:[%s3023_s2 + $0x30] sm:$0xff] }
 0x39d   : > { %1859 = vmatpush.msra.mxu0 %v1837_v7  ;;  %v1942_v7 = vld [vmem:[%s3008_s12 + $0x1] sm:$0x1] }
 0x39e   : > { %2229 = vmatmul.msk.f32.vlgmr.msrb.gmra.mxu0 %vm1348_vm11, %v1539_v11  ;;  %2231 = vmatmul.msk.f32.vlgmr.msra.gmra.mxu3 %vm1348_vm11, %v1741_v13  ;;  %v1881_v11 = vld [vmem:[%s3023_s2 + $0x48] sm:$0xff]  ;;  %v1880_v13 = vld [vmem:[%s3023_s2 + $0x40] sm:$0xff] }
 0x39f   : > { %2228 = vmatmul.msk.f32.vlgmr.msra.gmra.mxu2 %vm1348_vm11, %v1635_v14  ;;  %1860 = vmatpush.msra.mxu0 %v1836_v8  ;;  %v1918_v14 = vld [vmem:[%s3024_s3 + $0x40] sm:$0xff] }
 0x3a0   : > { %2230 = vmatmul.msk.f32.vlgmr.msra.gmra.mxu1 %vm1348_vm11, %v1591_v12  ;;  %1818 = vmatpush.msrb.mxu2 %v1801_v20  ;;  %v1919_v12 = vld [vmem:[%s3024_s3 + $0x48] sm:$0xff] }
 0x3a1   : > { %1861 = vmatpush.msra.mxu0 %v1835_v9  ;;  %1891 = vmatpush.msrb.mxu1 %v1881_v11  ;;  %v1915_v20 = vld [vmem:[%s3024_s3 + $0x28] sm:$0xff]  ;;  %v1964_v9 = vld [vmem:[%s2585_s20 + $0x10] sm:$0xff]  ;;  %v2033_v11 = vld [vmem:[%s2585_s20 + $0xb8] sm:$0xff] }
 0x3a2   : > { %1819 = vmatpush.msrb.mxu2 %v1800_v23  ;;  %1926 = vmatpush.msrb.mxu3 %v1919_v12  ;;  %v1829_v23 = vld [vmem:[%s3025_s6] sm:$0x1] }
 0x3a3   : > { %1862 = vmatpush.msra.mxu0 %v1834_v10  ;;  %1892 = vmatpush.msrb.mxu1 %v1880_v13  ;;  %v1999_v10 = vld [vmem:[%s2585_s20 + $0x68] sm:$0xff] }
 0x3a4   : > { %1820 = vmatpush.msrb.mxu2 %v1799_v24  ;;  %1927 = vmatpush.msrb.mxu3 %v1918_v14  ;;  %v1963_v14 = vld [vmem:[%s2585_s20 + $0x8] sm:$0xff] }
 0x3a5   : > { %1893 = vmatpush.msrb.mxu1 %v1879_v15  ;;  %v1998_v15 = vld [vmem:[%s2585_s20 + $0x60] sm:$0xff] }
 0x3a6   : > { %1821 = vmatpush.msrb.mxu2 %v1798_v28  ;;  %1928 = vmatpush.msrb.mxu3 %v1917_v16  ;;  %v2032_v16 = vld [vmem:[%s2585_s20 + $0xb0] sm:$0xff] }
 0x3a7   : > { %1894 = vmatpush.msrb.mxu1 %v1878_v17  ;;  %v1962_v17 = vld [vmem:[%s2585_s20] sm:$0xff] }
 0x3a8   : > { %1822 = vmatpush.msrb.mxu2 %v1797_v29  ;;  %v1875_v29 = vld [vmem:[%s3023_s2 + $0x18] sm:$0xff] }
 0x3aa   : > { %1823 = vmatpush.msrb.mxu2 %v1796_v33  ;;  %v1873_v33 = vld [vmem:[%s3023_s2 + $0x8] sm:$0xff] }
 0x3ac   : > { %1824 = vmatpush.msrb.mxu2 %v1795_v36  ;;  %v1910_v36 = vld [vmem:[%s3024_s3] sm:$0xff] }
 0x3ae   : > { %1981 = vmatpush.msra.mxu2 %v1971_v39  ;;  %v1961_v39 = vld [vmem:[%s2590_s27] sm:$0x1] }
 0x3b0   : > { %1982 = vmatpush.msra.mxu2 %v1970_v40 }
 0x413   : > { %v1588_v18 = vpop.f32.mrf.mxu0 }
 0x415   : > { %v1617_v22 = vpop.f32.mrf.mxu1 }
 0x419   : > { %v1663_v27 = vpop.f32.mrf.mxu3 }
 0x41a   : > { %v1565_v19 = vpop.f32.mrf.mxu2 }
 0x41b   : > { %v1589_v21 = vadd.f32 %v1588_v18, %v1565_v19  ;;  %v1711_v35 = vpop.f32.mrf.mxu0  ;;  %v1916_v18 = vld [vmem:[%s3024_s3 + $0x30] sm:$0xff]  ;;  %v1877_v19 = vld [vmem:[%s3023_s2 + $0x28] sm:$0xff] }
 0x41c   : > { %1929 = vmatpush.msrb.mxu3 %v1916_v18  ;;  %1895 = vmatpush.msrb.mxu1 %v1877_v19  ;;  %v1997_v18 = vld [vmem:[%s2585_s20 + $0x58] sm:$0xff] }
 0x41d   : > { %v1620_v25 = vadd.f32 %v1617_v22, %v1589_v21  ;;  %v1737_v2 = vpop.f32.mrf.mxu1  ;;  %v1876_v21 = vld [vmem:[%s3023_s2 + $0x20] sm:$0xff] }
 0x41e   : > { %v1914_v22 = vld [vmem:[%s3024_s3 + $0x20] sm:$0xff]  ;;  %1930 = vmatpush.msrb.mxu3 %v1915_v20  ;;  %1896 = vmatpush.msrb.mxu1 %v1876_v21  ;;  %v2031_v20 = vld [vmem:[%s2585_s20 + $0xa8] sm:$0xff] }
 0x41f   : > { %v1623_v30 = vmul.f32 %v2323_v26, %v1620_v25  ;;  %v1831_v25 = vld [vmem:[%s3025_s6 + $0x1] sm:$0x1] }
 0x420   : > { %1931 = vmatpush.msrb.mxu3 %v1914_v22  ;;  %1897 = vmatpush.msrb.mxu1 %v1875_v29 }
 0x421   : > { %v1626_v37 = vadd.f32 %v2324_v31, %v1623_v30  ;;  %v1767_v38 = vpop.f32.mrf.mxu3  ;;  %v1913_v30 = vld [vmem:[%s3024_s3 + $0x18] sm:$0xff]  ;;  %v1874_v31 = vld [vmem:[%s3023_s2 + $0x10] sm:$0xff] }
 0x422   : > { %v1686_v32 = vpop.f32.mrf.mxu2  ;;  %1932 = vmatpush.msrb.mxu3 %v1913_v30  ;;  %1898 = vmatpush.msrb.mxu1 %v1874_v31 }
 0x423   : > { %v1687_v34 = vadd.f32 %v1686_v32, %v1663_v27  ;;  %v1627_v41 = vmax.f32 %v1626_v37, 0.0  ;;  %v1912_v32 = vld [vmem:[%s3024_s3 + $0x10] sm:$0xff]  ;;  %v1867_v37 = vld [vmem:[%s3026_s5] sm:$0x1] }
 0x424   : > { %1933 = vmatpush.msrb.mxu3 %v1912_v32  ;;  %1899 = vmatpush.msrb.mxu1 %v1873_v33 }
 0x425   : > { %v1714_v63 = vadd.f32 %v1711_v35, %v1687_v34  ;;  %v1630_v47 = vmul.f32 %v2325_v42, %v1627_v41  ;;  %v1911_v34 = vld [vmem:[%s3024_s3 + $0x8] sm:$0xff]  ;;  %v1872_v35 = vld [vmem:[%s3023_s2] sm:$0xff]  ;;  %s3027_s2 = sld [smem:[#allocation26_spill]]  ;;  %v2005_v41 = vld [vmem:[%s2585_s20 + $0x98] sm:$0xff]  ;;  %s2100_s3 = scalar_lea.hbm %s2595_s4, %s2618_s0 }
 0x426   : > { %1934 = vmatpush.msrb.mxu3 %v1911_v34  ;;  %1900 = vmatpush.msrb.mxu1 %v1872_v35  ;;  %v2039_v42 = vld [vmem:[%s2585_s20 + $0xe8] sm:$0xff]  ;;  %s2104_s8 = sshll.u32 %s2100_s3, 4  ;;  %s2105_s8 = int_to_ptr.hbm [resolvable:$true] %s2104_s8 }
 0x427   : > { %v1740_v1 = vadd.f32 %v1737_v2, %v1714_v63  ;;  %v2847_v53 = vadd.f32 %v2326_v48, %v1630_v47  ;;  %v1869_v2 = vld [vmem:[%s3026_s5 + $0x1] sm:$0x1]  ;;  %2015 = vmatpush.msrb.mxu0 %v2005_v41  ;;  %v2003_v47 = vld [vmem:[%s2585_s20 + $0x88] sm:$0xff]  ;;  %v2037_v48 = vld [vmem:[%s2585_s20 + $0xd8] sm:$0xff]  ;;  %s2361_s0 = sshra.s32 %s2105_s8, 4  ;;  %s2362_s0 = int_to_ptr.hbm [resolvable:$true] %s2361_s0 }
 0x428   : > { %1935 = vmatpush.msrb.mxu3 %v1910_v36  ;;  %2049 = vmatpush.msra.mxu1 %v2039_v42  ;;  %p2368_p0 = scmp.lt.s32.totalorder %s2362_s0, %s2595_s4 }
 0x429   : > { %v1770_v43 = vadd.f32 %v1767_v38, %v1740_v1  ;;  %v1634_v56 = vmax.f32 %v2847_v53, 0.0 }
 0x42a   : > { %2050 = vmatpush.msra.mxu1 %v2038_v45 }
 0x42b   : > { %v1773_v46 = vmul.f32 %v2327_v3, %v1770_v43  ;;  %v1969_v43 = vld [vmem:[%s2585_s20 + $0x38] sm:$0xff] }
 0x42c   : > { %1983 = vmatpush.msra.mxu2 %v1969_v43  ;;  %2051 = vmatpush.msra.mxu1 %v2037_v48 }
 0x42d   : > { %v1776_v49 = vadd.f32 %v2328_v44, %v1773_v46  ;;  %v2004_v44 = vld [vmem:[%s2585_s20 + $0x90] sm:$0xff] }
 0x42e   : > { %2016 = vmatpush.msrb.mxu0 %v2004_v44  ;;  %v1968_v46 = vld [vmem:[%s2585_s20 + $0x30] sm:$0xff] }
 0x42f   : > { %v1777_v51 = vmax.f32 %v1776_v49, 0.0  ;;  %v1905_v49 = vld [vmem:[%s3027_s2] sm:$0x1]  ;;  %1984 = vmatpush.msra.mxu2 %v1968_v46 }
 0x430   : > { %2017 = vmatpush.msrb.mxu0 %v2003_v47 }
 0x431   : > { %v1780_v54 = vmul.f32 %v2329_v50, %v1777_v51  ;;  %v1967_v51 = vld [vmem:[%s2585_s20 + $0x28] sm:$0xff] }
 0x432   : > { %1985 = vmatpush.msra.mxu2 %v1967_v51 }
 0x433   : > { %v2849_v55 = vadd.f32 %v2330_v52, %v1780_v54  ;;  %v2002_v52 = vld [vmem:[%s2585_s20 + $0x80] sm:$0xff]  ;;  %v2036_v54 = vld [vmem:[%s2585_s20 + $0xd0] sm:$0xff] }
 0x434   : > { %2018 = vmatpush.msrb.mxu0 %v2002_v52  ;;  %2052 = vmatpush.msra.mxu1 %v2036_v54 }
 0x435   : > { %v1784_v57 = vmax.f32 %v2849_v55, 0.0 }
 0x437   : > { %v1785_v58 = vadd.f32 %v1784_v57, %v1634_v56 }
 0x439   : > { %v1787_v59 = vsel %vm1786_vm14, %v1785_v58, 0.0  ;;  %v1966_v58 = vld [vmem:[%s2585_s20 + $0x20] sm:$0xff] }
 0x43a   : > { %v1788_v60 = vrot.slane %v1787_v59, 4  ;;  %1986 = vmatpush.msra.mxu2 %v1966_v58 }
 0x43c   : > { %v1789_v61 = vadd.f32 %v1788_v60, %v1787_v59  ;;  %v2001_v59 = vld [vmem:[%s2585_s20 + $0x78] sm:$0xff]  ;;  %v2035_v60 = vld [vmem:[%s2585_s20 + $0xc8] sm:$0xff] }
 0x43d   : > { %2019 = vmatpush.msrb.mxu0 %v2001_v59  ;;  %2053 = vmatpush.msra.mxu1 %v2035_v60 }
 0x43e   : > { %v1790_v62 = vrot.slane %v1789_v61, 2 }
 0x440   : > { %v1791_v0 = vadd.f32 %v1790_v62, %v1789_v61  ;;  %v1907_v62 = vld [vmem:[%s3027_s2 + $0x1] sm:$0x1]  ;;  %s893_s2 = sand.u32 1, %s2401_s10  }
 0x441   : > { %s894_s5 = scalar_lea.vmem [#allocation7], %s893_s2  ;;  %s2092_s9 = scalar_lea.sflag [#allocation8], %s893_s2 }
 0x442   : > { %v1792_v4 = vrot.slane %v1791_v0, 1  ;;  %s2102_s6 = sshll.u32 %s894_s5, 4  ;;  %s2103_s6 = int_to_ptr.vmem [resolvable:$true] %s2102_s6 }
 0x444   : > { %v1793_v5 = vadd.f32 %v1792_v4, %v1791_v0  ;;  %v1940_v0 = vld [vmem:[%s3008_s12] sm:$0x1]  ;;  %v1965_v4 = vld [vmem:[%s2585_s20 + $0x18] sm:$0xff]  ;;  %s2363_s12 = scalar_lea.hbm %s2362_s0, 1 }
 0x445   : > { %1987 = vmatpush.msra.mxu2 %v1965_v4  ;;  %p2364_p11 = scmp.ne.s32.totalorder %s2362_s0, %s2363_s12  ;;  %p2369_p1 = scmp.lt.s32.totalorder %s2367_s13, %s2363_s12 }
 0x446   : > { %v1794_v6 = vmul.f32 0.33333334, %v1793_v5  ;;  %v2000_v5 = vld [vmem:[%s2585_s20 + $0x70] sm:$0xff] }
 0x447   : > { %2020 = vmatpush.msrb.mxu0 %v2000_v5  ;;  %1988 = vmatpush.msra.mxu2 %v1964_v9  ;;  %p2365_p12 = pnand %p2364_p11, %p2635_p5  ;;  %p2370_p2 = por %p2369_p1, %p2368_p0 }
 0x448   : > { %2232 = vmatmul.msk.f32.vlgmr.msrb.gmra.mxu2 %vm1805_vm15, %v1794_v6  ;;  %v2034_v6 = vld [vmem:[%s2585_s20 + $0xc0] sm:$0xff] }
 0x449   : > { %2054 = vmatpush.msra.mxu1 %v2034_v6  ;;  %2021 = vmatpush.msrb.mxu0 %v1999_v10  ;;  %p2366_p13 = pneg %p2365_p12 }
 0x44a   : > { %1989 = vmatpush.msra.mxu2 %v1963_v14 }
 0x44b   : > { %2055 = vmatpush.msra.mxu1 %v2033_v11  ;;  %2022 = vmatpush.msrb.mxu0 %v1998_v15  ;;  %p2371_p3 = pnand %p2370_p2, %p2366_p13 }
 0x44c   : > { %1990 = vmatpush.msra.mxu2 %v1962_v17 }
 0x44d   : > { %2056 = vmatpush.msra.mxu1 %v2032_v16  ;;  %2023 = vmatpush.msrb.mxu0 %v1997_v18 }
 0x44f   : > { %2057 = vmatpush.msra.mxu1 %v2031_v20 }
 0x4cb   : > { %v1826_v24 = vpop.f32.mrf.mxu2 }
 0x4cc   : > { %v1830_v26 = vmul.f32 %v1829_v23, %v1826_v24  ;;  %v1996_v23 = vld [vmem:[%s2585_s20 + $0x50] sm:$0xff]  ;;  %v2030_v24 = vld [vmem:[%s2585_s20 + $0xa0] sm:$0xff] }
 0x4cd   : > { %2024 = vmatpush.msrb.mxu0 %v1996_v23  ;;  %2058 = vmatpush.msra.mxu1 %v2030_v24 }
 0x4ce   : > { %v1832_v27 = vadd.f32 %v1831_v25, %v1830_v26 }
 0x4d0   : > { %v1833_v28 = vmax.f32 %v1832_v27, 0.0 }
 0x4d2   : > { %2234 = vmatmul.msk.f32.vlgmr.msra.gmra.mxu0 %vm1384_vm12, %v1833_v28 }
 0x54f   : > { %v1864_v63 = vpop.f32.mrf.mxu0 }
 0x550   : > { %v1868_v1 = vmul.f32 %v1867_v37, %v1864_v63 }
 0x552   : > { %v1870_v3 = vadd.f32 %v1869_v2, %v1868_v1 }
 0x554   : > { %v1871_v38 = vmax.f32 %v1870_v3, 0.0 }
 0x556   : > { %2235 = vmatmul.msk.f32.vlgmr.msrb.gmra.mxu1 %vm1805_vm15, %v1871_v38  ;;  %2236 = vmatmul.msk.f32.vlgmr.msrb.gmra.mxu3 %vm1805_vm15, %v1871_v38 }
 0x5d3   : > { %v1902_v50 = vpop.f32.mrf.mxu1 }
 0x5d4   : > { %v1906_v61 = vmul.f32 %v1905_v49, %v1902_v50 }
 0x5d6   : > { %v1908_v12 = vadd.f32 %v1907_v62, %v1906_v61 }
 0x5d8   : > { %v1909_v21 = vmax.f32 %v1908_v12, 0.0 }
 0x5d9   : > { %v1937_v8 = vpop.f32.mrf.mxu3 }
 0x5da   : > { %v1941_v13 = vmul.f32 %v1940_v0, %v1937_v8 }
 0x5dc   : > { %v1943_v19 = vadd.f32 %v1942_v7, %v1941_v13 }
 0x5de   : > { %v1944_v22 = vmax.f32 %v1943_v19, 0.0 }
 0x5e0   : > { %v1945_v25 = vmax.f32 %v1909_v21, %v1944_v22 }
 0x5e2   : > { %v1946_v26 = vsub.f32 %v1909_v21, %v1945_v25  ;;  %v1949_v27 = vsub.f32 %v1944_v22, %v1945_v25 }
 0x5e4   : > { %v1947_v28 = vmul.f32 1.442695, %v1946_v26  ;;  %v1950_v29 = vmul.f32 1.442695, %v1949_v27 }
 0x5e6   : > { %2337 = vpow2.f32 %v1947_v28 }
 0x5e7   : > { %2339 = vpow2.f32 %v1950_v29 }
 0x5ec   : > { %v2338_v30 = vpop.eup %2337 }
 0x5ed   : > { %v2340_v31 = vpop.eup %2339 }
 0x5ee   : > { %v1952_v32 = vadd.f32 %v2340_v31, %v2338_v30 }
 0x5f0   : > { %2341 = vrcp.f32 %v1952_v32 }
 0x5f6   : > { %v2342_v33 = vpop.eup %2341 }
 0x5f7   : > { %v1954_v34 = vmul.f32 %v2342_v33, %v2338_v30  ;;  %v1957_v35 = vmul.f32 %v2342_v33, %v2340_v31 }
 0x5f9   : > { %v1955_v36 = vperm.slane %v1954_v34, 0  ;;  %v1958_v37 = vperm.slane %v1957_v35, 0 }
 0x5fb   : > { %v1956_v63 = vmul.f32 %v1955_v36, %v1634_v56  ;;  %v1959_v2 = vmul.f32 %v1958_v37, %v1784_v57 }
 0x5fd   : > { %v1960_v1 = vadd.f32 %v1959_v2, %v1956_v63 }
 0x5ff   : > { %2237 = vmatmul.msk.f32.vlgmr.msra.gmra.mxu2 %vm1805_vm15, %v1960_v1  ;;  %v2006_v3 = vrot.slane %v1960_v1, 1  ;;  %v2040_v38 = vrot.slane %v1960_v1, 2 }
 0x601   : > { %2238 = vmatmul.msk.f32.vlgmr.msrb.gmra.mxu0 %vm1805_vm15, %v2006_v3  ;;  %2239 = vmatmul.msk.f32.vlgmr.msra.gmra.mxu1 %vm1805_vm15, %v2040_v38 }
 0x67e   : > { %v2026_v42 = vpop.f32.mrf.mxu0  ;;  %v2060_v44 = vpop.f32.mrf.mxu1 }
 0x682   : > { %v1992_v40 = vpop.f32.mrf.mxu2 }
 0x683   : > { %v1995_v41 = vadd.f32 %v1992_v40, %v1961_v39 }
 0x685   : > { %v2029_v43 = vadd.f32 %v2026_v42, %v1995_v41 }
 0x687   : > { %v2063_v53 = vadd.f32 %v2060_v44, %v2029_v43 }
 0x689   : > { %v2065_v55 = vsel %vm2064_vm0, %v2063_v53, -inf }
 0x68a   : > { %2066 = vmax.xlane.f32.xlu0 %v2065_v55 }
 0x6fd   : > { %v2067_v56 = vpop.xlane.xlu0 %2066 }
 0x6fe   : > { %v2068_v57 = vsub.f32 %v2063_v53, %v2067_v56 }
 0x700   : > { %v2069_v45 = vmul.f32 1.442695, %v2068_v57 }
 0x702   : > { %2343 = vpow2.f32 %v2069_v45 }
 0x708   : > { %v2344_v46 = vpop.eup %2343 }
 0x709   : > { %v2071_v47 = vsel %vm2064_vm0, %v2344_v46, 0.0 }
 0x70a   : > { %2072 = vadd.xlane.f32.xlu0 %v2071_v47 }
 0x77d   : > { %v2073_v48 = vpop.xlane.xlu0 %2072 }
 0x77e   : > { %2345 = vrcp.f32 %v2073_v48  ;;  %v2085_v52 = vand.u32 2147483648, %v2073_v48  ;;  %v2083_v58 = vand.u32 2147483647, %v2073_v48  ;;  %vm2079_vm2 = vweird.f32 %v2073_v48 }
 0x780   : > { %v2086_v60 = vor.u32 1.1754944e-38, %v2085_v52  ;;  %vm2084_vm4 = vcmp.eq.f32.partialorder %v2083_v58, 8.507059e+37 }
 0x784   : > { %v2346_v49 = vpop.eup %2345 }
 0x785   : > { %v2075_v50 = vmul.f32 %v2346_v49, %v2073_v48  ;;  %vm2080_vm1 = vweird.f32 %v2346_v49 }
 0x786   : > { %vm2081_vm3 = vmor %vm2079_vm2, %vm2080_vm1 }
 0x787   : > { %v2076_v51 = vsub.f32 1.0, %v2075_v50 }
 0x789   : > { %v2077_v54 = vmul.f32 %v2346_v49, %v2076_v51 }
 0x78b   : > { %v2078_v59 = vadd.f32 %v2346_v49, %v2077_v54 }
 0x78d   : > { %v2082_v61 = vsel %vm2081_vm3, %v2346_v49, %v2078_v59 }
 0x78e   : > { %v2087_v62 = vsel %vm2084_vm4, %v2086_v60, %v2082_v61 }
 0x78f   : > { %v2089_v0 = vmul.f32 %v2344_v46, %v2087_v62 }
 0x791   : > { %2090 = vst.msk [vmem:[%s894_s5] sm:$0x1] %vm2064_vm0, %v2089_v0 }
 0x792   : > { %2374 = shalt.err (!%p2371_p3)
}
 0x793   : > { %2243 = dma.vmem_to_hbm [thread:$0]  (%p2635_p5), %s2103_s6, 16, %s2105_s8, %s2092_s9  }
 0x794 PF: > { %p2249_p4 = scmp.ge.s32.totalorder %s2409_s15, 2  ;;  %s2116_s5 = sand.u32 1, %s2397_s7  }
 0x795   : > { %s2117_s3 = scalar_lea.sflag [#allocation8], %s2116_s5 }
 0x796   : > { %p2246_p7 = pnand %p2249_p4, %p2639_p6 }
 0x798   : > { %p2247_p8 = pneg %p2246_p7 }
 0x79a   : > { %2392 = dma.done.wait (%p2247_p8), %s2117_s3, 16  }
 0x79b   : > { %2394 = vsyncadd (%p2247_p8), %s2117_s3, 4294967280  ;;  %p69_p9 = scmp.ge.s32.totalorder %s2622_s18, 4   ;;  %s3028_s7 = smov %s2401_s10 }
 0x79c   : > { %s3029_s10 = smov %s2405_s11  ;;  %s3030_s11 = smov %s2633_s26 }
 0x79d   : > { %s3031_s15 = smov %s2622_s18  ;;  %71 = sbr.rel (!%p69_p9) target bundleno = 60 (0x3c), region = 200 }
 0x7a2   :  { %2122 = vsyncpa [#allocation8], 1 }
 0x7a3   :  { %2124 = vsyncpa [#allocation8 + $0x1], 1 }

</bundles_post_ra>
